<compile_context>
chip_gen: v5e
topology: v5e:2x2
jax: 0.10.0
libtpu: 0.0.40
codegen_flags: <defaults>
</compile_context>

<pallas_src>
import numpy as np
import jax
import jax.numpy as jnp
from jax.experimental import pallas as pl
from jax.experimental.pallas import tpu as pltpu

EPS = 1e-5  # nn.BatchNorm1d default eps


def tcr_kernel(xcol_ref, wbr_ref, bbr_ref, wf1_ref, t1_ref,
               wf2_ref, t2_ref, wfc_ref, t3_ref, out_ref):
    M = xcol_ref.shape[1]            # Bt * L rows per grid step
    Bt = out_ref.shape[1]
    L = M // Bt
    f32 = jnp.float32

    x = xcol_ref[0]                  # [M, K1p]  (zero-padded im2col of the 7-tap window)

    # All three conv branches (k=3/5/7) + channel concat as one lane-dense matmul.
    h = jnp.dot(x, wbr_ref[...], preferred_element_type=f32) + bbr_ref[...]
    h = jnp.maximum(h, 0.0)                                        # [M, 256]

    # Fusion 1x1 conv; BN1 scale folded into the weight host-side.
    f1 = jnp.dot(h.astype(wf1_ref.dtype), wf1_ref[...],
                 preferred_element_type=f32) + t1_ref[...]
    f1 = jnp.maximum(f1, 0.0)                                      # [M, 128]

    # 3-tap fusion conv: sublane rolls + boundary masks + ONE [M,384]@[384,128] matmul.
    pos = jax.lax.broadcasted_iota(jnp.int32, (M, 1), 0) % L
    f1_dn = jnp.where(pos != 0, pltpu.roll(f1, 1, axis=0), 0.0)          # f1[m-1]
    f1_up = jnp.where(pos != (L - 1), pltpu.roll(f1, M - 1, axis=0), 0.0)  # f1[m+1]
    cdt = wf2_ref.dtype
    f1cat = jnp.concatenate(
        [f1_dn.astype(cdt), f1.astype(cdt), f1_up.astype(cdt)], axis=1)  # [M, 384]
    f2 = jnp.dot(f1cat, wf2_ref[...], preferred_element_type=f32) + t2_ref[...]
    f2 = jnp.maximum(f2, 0.0)                                      # [M, 128]

    # adaptive_max_pool1d(., 1): per-batch-element max over the sequence axis.
    pooled = jnp.max(f2.reshape(Bt, L, f2.shape[-1]), axis=1)      # [Bt, 128]

    # fc: Linear + BN3 (scale folded into the weight; shift added here).
    y = jnp.dot(pooled.astype(wfc_ref.dtype), wfc_ref[...],
                preferred_element_type=f32) + t3_ref[...]
    out_ref[0] = y.astype(out_ref.dtype)


def _round_up(n, m):
    return (n + m - 1) // m * m


def _pick_block_batch(B, L, target_rows=512):
    divs = [d for d in range(1, B + 1) if B % d == 0]
    feas = [d for d in divs if d * L <= max(target_rows, L)] or [1]
    # Prefer an even number of grid steps >= 2 (balanced v7x TC occupancy),
    # then >= 2 steps, then just the biggest feasible block.
    even = [d for d in feas if (B // d) >= 2 and (B // d) % 2 == 0]
    two = [d for d in feas if (B // d) >= 2]
    return max(even or two or feas)


def init_params(key, in_channels=32, feature_dim=128):
    ks = jax.random.split(key, 12)

    def w(k, shape, scale=0.1):
        return jax.random.normal(k, shape, jnp.float32) * scale

    p = {}
    # PyTorch layouts: Conv1d weight [O, I, K], Linear weight [O, I]
    p['w1'] = w(ks[0], (64, in_channels, 3)); p['b1'] = w(ks[1], (64,))
    p['w2'] = w(ks[2], (64, in_channels, 5)); p['b2'] = w(ks[3], (64,))
    p['w3'] = w(ks[4], (64, in_channels, 7)); p['b3'] = w(ks[5], (64,))
    p['wf1'] = w(ks[6], (128, 192, 1));       p['bf1'] = w(ks[7], (128,))
    p['wf2'] = w(ks[8], (128, 128, 3));       p['bf2'] = w(ks[9], (128,))
    p['wfc'] = w(ks[10], (feature_dim, 128)); p['bfc'] = w(ks[11], (feature_dim,))
    # BatchNorm at PyTorch init: gamma=1, beta=0, running_mean=0, running_var=1
    for name, c in (('bn1', 128), ('bn2', 128), ('bn3', feature_dim)):
        p[name + '_gamma'] = jnp.ones((c,), jnp.float32)
        p[name + '_beta'] = jnp.zeros((c,), jnp.float32)
        p[name + '_mean'] = jnp.zeros((c,), jnp.float32)
        p[name + '_var'] = jnp.ones((c,), jnp.float32)
    return p


def tcr_extractor_pallas(x, p, *, compute_dtype=jnp.bfloat16, block_batch=None):
    B, L, Cin = x.shape
    Bt = block_batch if block_batch is not None else _pick_block_batch(B, L)
    assert B % Bt == 0, "block_batch must divide the batch size"
    G = B // Bt
    M = Bt * L

    K1 = 7 * Cin
    K1p = _round_up(K1, 128)      # lane-dense im2col K dim (224 -> 256 for Cin=32)
    Cbr = 192                     # 3 branches x 64 channels
    Cbrp = _round_up(Cbr, 128)    # lane-dense branch-concat channel dim (-> 256)

    xf = x.astype(jnp.float32)
    # im2col for the merged 7-tap branch conv: [B, L, 7*Cin] -> [G, Bt*L, K1p]
    xp = jnp.pad(xf, ((0, 0), (3, 3), (0, 0)))
    xcol = jnp.concatenate([xp[:, t:t + L, :] for t in range(7)], axis=-1)
    xcol = jnp.pad(xcol, ((0, 0), (0, 0), (0, K1p - K1)))
    xcol = xcol.reshape(G, M, K1p).astype(compute_dtype)

    # Merged branch weight: conv1/2/3 zero-padded into a common 7-tap window.
    def branch_taps(w):                          # w: [O, Cin, K] (PyTorch layout)
        O, _, K = w.shape
        wt = jnp.transpose(w, (2, 1, 0))         # [K, Cin, O]
        off = (7 - K) // 2
        full_w = jnp.zeros((7, Cin, O), jnp.float32).at[off:off + K].set(wt)
        return full_w.reshape(7 * Cin, O)

    wbr = jnp.concatenate(
        [branch_taps(p['w1']), branch_taps(p['w2']), branch_taps(p['w3'])], axis=1)
    wbr = jnp.pad(wbr, ((0, K1p - K1), (0, Cbrp - Cbr)))            # [K1p, Cbrp]
    bbr = jnp.pad(jnp.concatenate([p['b1'], p['b2'], p['b3']]),
                  (0, Cbrp - Cbr))[None, :]                         # [1, Cbrp]

    def bn_fold(name, bias):
        s = p[name + '_gamma'] / jnp.sqrt(p[name + '_var'] + EPS)
        t = (bias - p[name + '_mean']) * s + p[name + '_beta']
        return s, t[None, :]

    s1, t1 = bn_fold('bn1', p['bf1'])
    s2, t2 = bn_fold('bn2', p['bf2'])
    s3, t3 = bn_fold('bn3', p['bfc'])

    # BN scales folded into the weights (per output channel).
    wf1 = jnp.transpose(p['wf1'][:, :, 0], (1, 0)) * s1[None, :]    # [192, 128]
    wf1 = jnp.pad(wf1, ((0, Cbrp - Cbr), (0, 0)))                   # [Cbrp, 128]
    # 3-tap fusion weights concatenated for one [M,384]@[384,128] matmul:
    # rows [0:128] multiply f1[m-1], [128:256] f1[m], [256:384] f1[m+1].
    wf2 = jnp.concatenate([jnp.transpose(p['wf2'][:, :, k], (1, 0)) * s2[None, :]
                           for k in range(3)], axis=0)              # [384, 128]
    wfc = jnp.transpose(p['wfc'], (1, 0)) * s3[None, :]             # [128, Fd]
    Fd = wfc.shape[1]

    wbr = wbr.astype(compute_dtype)
    wf1 = wf1.astype(compute_dtype)
    wf2 = wf2.astype(compute_dtype)
    wfc = wfc.astype(compute_dtype)

    def full(arr):
        n = arr.ndim
        return pl.BlockSpec(arr.shape, lambda g, _n=n: (0,) * _n)

    bpe = jnp.dtype(compute_dtype).itemsize
    flops = 2 * G * M * (K1p * Cbrp + Cbrp * 128 + 384 * 128) + 2 * B * 128 * Fd
    bytes_accessed = (xcol.size * bpe
                      + (wbr.size + wf1.size + wf2.size + wfc.size) * bpe
                      + (bbr.size + t1.size + t2.size + t3.size) * 4
                      + B * Fd * 4)

    out = pl.pallas_call(
        tcr_kernel,
        out_shape=jax.ShapeDtypeStruct((G, Bt, Fd), jnp.float32),
        grid_spec=pltpu.PrefetchScalarGridSpec(
            num_scalar_prefetch=0,
            grid=(G,),
            in_specs=[
                pl.BlockSpec((1, M, K1p), lambda g: (g, 0, 0)),     # im2col'd x
                full(wbr), full(bbr),
                full(wf1), full(t1),
                full(wf2), full(t2),
                full(wfc), full(t3),
            ],
            out_specs=pl.BlockSpec((1, Bt, Fd), lambda g: (g, 0, 0)),
        ),
        compiler_params=pltpu.CompilerParams(dimension_semantics=("parallel",)),
        cost_estimate=pl.CostEstimate(flops=int(flops), transcendentals=0,
                                      bytes_accessed=int(bytes_accessed)),
    )(xcol, wbr, bbr, wf1, t1, wf2, t2, wfc, t3)
    return out.reshape(B, Fd)


def tcr_extractor_ref(x, p):
    """Pure-JAX reference with the same (inference-mode BN) semantics."""
    xt = jnp.transpose(x.astype(jnp.float32), (0, 2, 1))           # [B, C, L] (NCL)
    hi = jax.lax.Precision.HIGHEST

    def conv1d(z, w, b, pad):
        y = jax.lax.conv_general_dilated(z, w, (1,), [(pad, pad)],
                                         dimension_numbers=('NCH', 'OIH', 'NCH'),
                                         precision=hi)
        return y + b[None, :, None]

    def bn(z, name):
        g, bb = p[name + '_gamma'], p[name + '_beta']
        m, v = p[name + '_mean'], p[name + '_var']
        if z.ndim == 3:
            return ((z - m[None, :, None]) / jnp.sqrt(v[None, :, None] + EPS)
                    * g[None, :, None] + bb[None, :, None])
        return (z - m) / jnp.sqrt(v + EPS) * g + bb

    h1 = jax.nn.relu(conv1d(xt, p['w1'], p['b1'], 1))
    h2 = jax.nn.relu(conv1d(xt, p['w2'], p['b2'], 2))
    h3 = jax.nn.relu(conv1d(xt, p['w3'], p['b3'], 3))
    h = jnp.concatenate([h1, h2, h3], axis=1)
    f = jax.nn.relu(bn(conv1d(h, p['wf1'], p['bf1'], 0), 'bn1'))
    f = jax.nn.relu(bn(conv1d(f, p['wf2'], p['bf2'], 1), 'bn2'))
    pooled = jnp.max(f, axis=2)
    y = jnp.dot(pooled, p['wfc'].T, precision=hi) + p['bfc']
    return bn(y, 'bn3')


if __name__ == "__main__":
    key = jax.random.PRNGKey(0)
    kx, kp = jax.random.split(key)
    B, L, Cin, Fd = 8, 16, 32, 128
    x = jax.random.normal(kx, (B, L, Cin), jnp.float32)
    params = init_params(kp, in_channels=Cin, feature_dim=Fd)

    ref = tcr_extractor_ref(x, params)

    # Default bf16 matmul-operand path (MXU-native on v5e/v6e/v7x), f32 accumulation.
    out_bf16 = jax.block_until_ready(tcr_extractor_pallas(x, params))
    assert out_bf16.shape == (B, Fd)
    np.testing.assert_allclose(np.asarray(out_bf16), np.asarray(ref),
                               atol=2e-1, rtol=5e-2)

    # f32 matmul-operand path (closer check of the exact semantics).
    out_f32 = jax.block_until_ready(
        tcr_extractor_pallas(x, params, compute_dtype=jnp.float32))
    np.testing.assert_allclose(np.asarray(out_f32), np.asarray(ref),
                               atol=2e-2, rtol=1e-2)

    print("KERNEL_OK")
</pallas_src>

<mosaic_0001>
module attributes {stable_mosaic.version = 11 : i64} {
  func.func @tcr_kernel(%arg0: i32, %arg1: memref<1x64x256xbf16, #tpu.memory_space<vmem>>, %arg2: memref<256x256xbf16, #tpu.memory_space<vmem>>, %arg3: memref<1x256xf32, #tpu.memory_space<vmem>>, %arg4: memref<256x128xbf16, #tpu.memory_space<vmem>>, %arg5: memref<1x128xf32, #tpu.memory_space<vmem>>, %arg6: memref<384x128xbf16, #tpu.memory_space<vmem>>, %arg7: memref<1x128xf32, #tpu.memory_space<vmem>>, %arg8: memref<128x128xbf16, #tpu.memory_space<vmem>>, %arg9: memref<1x128xf32, #tpu.memory_space<vmem>>, %arg10: memref<1x4x128xf32, #tpu.memory_space<vmem>>) attributes {dimension_semantics = [#tpu.dimension_semantics<parallel>], iteration_bounds = array<i64: 2>, scalar_prefetch = 0 : i64, scratch_operands = 0 : i64, tpu.core_type = #tpu.core_type<tc>, window_params = [{transform_indices = @transform_0, window_bounds = array<i64: 1, 64, 256>}, {pipeline_mode = #tpu.pipeline_mode<synchronous>, transform_indices = @transform_1, window_bounds = array<i64: 256, 256>}, {pipeline_mode = #tpu.pipeline_mode<synchronous>, transform_indices = @transform_2, window_bounds = array<i64: 1, 256>}, {pipeline_mode = #tpu.pipeline_mode<synchronous>, transform_indices = @transform_3, window_bounds = array<i64: 256, 128>}, {pipeline_mode = #tpu.pipeline_mode<synchronous>, transform_indices = @transform_4, window_bounds = array<i64: 1, 128>}, {pipeline_mode = #tpu.pipeline_mode<synchronous>, transform_indices = @transform_5, window_bounds = array<i64: 384, 128>}, {pipeline_mode = #tpu.pipeline_mode<synchronous>, transform_indices = @transform_6, window_bounds = array<i64: 1, 128>}, {pipeline_mode = #tpu.pipeline_mode<synchronous>, transform_indices = @transform_7, window_bounds = array<i64: 128, 128>}, {pipeline_mode = #tpu.pipeline_mode<synchronous>, transform_indices = @transform_8, window_bounds = array<i64: 1, 128>}, {transform_indices = @transform_9, window_bounds = array<i64: 1, 4, 128>}]} {
    %c0 = arith.constant 0 : index
    %c0_0 = arith.constant 0 : index
    %c0_1 = arith.constant 0 : index
    %0 = vector.load %arg1[%c0, %c0_0, %c0_1] : memref<1x64x256xbf16, #tpu.memory_space<vmem>>, vector<1x64x256xbf16>
    %1 = vector.shape_cast %0 : vector<1x64x256xbf16> to vector<64x256xbf16>
    %c0_2 = arith.constant 0 : index
    %c0_3 = arith.constant 0 : index
    %2 = vector.load %arg2[%c0_2, %c0_3] : memref<256x256xbf16, #tpu.memory_space<vmem>>, vector<256x256xbf16>
    %cst = arith.constant dense<0.000000e+00> : vector<64x256xf32>
    %3 = tpu.matmul %1, %2, %cst {dimension_numbers = #tpu.dot_dimension_numbers<[1], [0], [0], [1], [0, 0, 1, 1], [], []>} : vector<64x256xbf16>, vector<256x256xbf16>, vector<64x256xf32> -> vector<64x256xf32>
    %c0_4 = arith.constant 0 : index
    %c0_5 = arith.constant 0 : index
    %4 = vector.load %arg3[%c0_4, %c0_5] : memref<1x256xf32, #tpu.memory_space<vmem>>, vector<1x256xf32>
    %5 = vector.broadcast %4 : vector<1x256xf32> to vector<64x256xf32>
    %6 = arith.addf %3, %5 : vector<64x256xf32>
    %cst_6 = arith.constant 0.000000e+00 : f32
    %7 = vector.broadcast %cst_6 : f32 to vector<64x256xf32>
    %8 = arith.maximumf %6, %7 : vector<64x256xf32>
    %9 = arith.truncf %8 : vector<64x256xf32> to vector<64x256xbf16>
    %c0_7 = arith.constant 0 : index
    %c0_8 = arith.constant 0 : index
    %10 = vector.load %arg4[%c0_7, %c0_8] : memref<256x128xbf16, #tpu.memory_space<vmem>>, vector<256x128xbf16>
    %cst_9 = arith.constant dense<0.000000e+00> : vector<64x128xf32>
    %11 = tpu.matmul %9, %10, %cst_9 {dimension_numbers = #tpu.dot_dimension_numbers<[1], [0], [0], [1], [0, 0, 1, 1], [], []>} : vector<64x256xbf16>, vector<256x128xbf16>, vector<64x128xf32> -> vector<64x128xf32>
    %c0_10 = arith.constant 0 : index
    %c0_11 = arith.constant 0 : index
    %12 = vector.load %arg5[%c0_10, %c0_11] : memref<1x128xf32, #tpu.memory_space<vmem>>, vector<1x128xf32>
    %13 = vector.broadcast %12 : vector<1x128xf32> to vector<64x128xf32>
    %14 = arith.addf %11, %13 : vector<64x128xf32>
    %cst_12 = arith.constant 0.000000e+00 : f32
    %15 = vector.broadcast %cst_12 : f32 to vector<64x128xf32>
    %16 = arith.maximumf %14, %15 : vector<64x128xf32>
    %17 = tpu.iota {dimensions = array<i32: 0>} : vector<64x1xi32>
    %c16_i32 = arith.constant 16 : i32
    %c0_i32 = arith.constant 0 : i32
    %18 = arith.cmpi eq, %c16_i32, %c0_i32 : i32
    %c1_i32 = arith.constant 1 : i32
    %19 = arith.select %18, %c1_i32, %c16_i32 : i32
    %20 = vector.broadcast %19 : i32 to vector<64x1xi32>
    %21 = arith.remsi %17, %20 : vector<64x1xi32>
    %c0_i32_13 = arith.constant 0 : i32
    %22 = vector.broadcast %c0_i32_13 : i32 to vector<64x1xi32>
    %23 = arith.cmpi ne, %21, %22 : vector<64x1xi32>
    %c0_i32_14 = arith.constant 0 : i32
    %24 = vector.broadcast %c0_i32_14 : i32 to vector<64x1xi32>
    %25 = arith.cmpi slt, %21, %24 : vector<64x1xi32>
    %c0_i32_15 = arith.constant 0 : i32
    %26 = arith.cmpi slt, %19, %c0_i32_15 : i32
    %27 = vector.broadcast %26 : i1 to vector<64x1xi1>
    %28 = vector.broadcast %27 : vector<64x1xi1> to vector<64x1xi1>
    %29 = arith.xori %25, %28 : vector<64x1xi1>
    %30 = arith.andi %29, %23 : vector<64x1xi1>
    %31 = vector.broadcast %19 : i32 to vector<64x1xi32>
    %32 = arith.addi %21, %31 : vector<64x1xi32>
    %33 = arith.select %30, %32, %21 : vector<64x1xi1>, vector<64x1xi32>
    %c0_i32_16 = arith.constant 0 : i32
    %34 = vector.broadcast %c0_i32_16 : i32 to vector<64x1xi32>
    %35 = arith.cmpi ne, %33, %34 : vector<64x1xi32>
    %c1_i32_17 = arith.constant 1 : i32
    %36 = tpu.dynamic_rotate %16 by %c1_i32_17 dim 0 : vector<64x128xf32>, i32 -> vector<64x128xf32>
    %cst_18 = arith.constant 0.000000e+00 : f32
    %37 = vector.shape_cast %35 : vector<64x1xi1> to vector<64x1xi1>
    %38 = vector.broadcast %37 : vector<64x1xi1> to vector<64x128xi1>
    %39 = vector.broadcast %cst_18 : f32 to vector<64x128xf32>
    %40 = arith.select %38, %36, %39 : vector<64x128xi1>, vector<64x128xf32>
    %c15_i32 = arith.constant 15 : i32
    %41 = vector.broadcast %c15_i32 : i32 to vector<64x1xi32>
    %42 = arith.cmpi ne, %33, %41 : vector<64x1xi32>
    %c63_i32 = arith.constant 63 : i32
    %43 = tpu.dynamic_rotate %16 by %c63_i32 dim 0 : vector<64x128xf32>, i32 -> vector<64x128xf32>
    %cst_19 = arith.constant 0.000000e+00 : f32
    %44 = vector.shape_cast %42 : vector<64x1xi1> to vector<64x1xi1>
    %45 = vector.broadcast %44 : vector<64x1xi1> to vector<64x128xi1>
    %46 = vector.broadcast %cst_19 : f32 to vector<64x128xf32>
    %47 = arith.select %45, %43, %46 : vector<64x128xi1>, vector<64x128xf32>
    %48 = arith.truncf %40 : vector<64x128xf32> to vector<64x128xbf16>
    %49 = arith.truncf %16 : vector<64x128xf32> to vector<64x128xbf16>
    %50 = arith.truncf %47 : vector<64x128xf32> to vector<64x128xbf16>
    %51 = tpu.concatenate %48, %49, %50 in 1 : vector<64x128xbf16>, vector<64x128xbf16>, vector<64x128xbf16> -> vector<64x384xbf16>
    %c0_20 = arith.constant 0 : index
    %c0_21 = arith.constant 0 : index
    %52 = vector.load %arg6[%c0_20, %c0_21] : memref<384x128xbf16, #tpu.memory_space<vmem>>, vector<384x128xbf16>
    %cst_22 = arith.constant dense<0.000000e+00> : vector<64x128xf32>
    %53 = tpu.matmul %51, %52, %cst_22 {dimension_numbers = #tpu.dot_dimension_numbers<[1], [0], [0], [1], [0, 0, 1, 1], [], []>} : vector<64x384xbf16>, vector<384x128xbf16>, vector<64x128xf32> -> vector<64x128xf32>
    %c0_23 = arith.constant 0 : index
    %c0_24 = arith.constant 0 : index
    %54 = vector.load %arg7[%c0_23, %c0_24] : memref<1x128xf32, #tpu.memory_space<vmem>>, vector<1x128xf32>
    %55 = vector.broadcast %54 : vector<1x128xf32> to vector<64x128xf32>
    %56 = arith.addf %53, %55 : vector<64x128xf32>
    %cst_25 = arith.constant 0.000000e+00 : f32
    %57 = vector.broadcast %cst_25 : f32 to vector<64x128xf32>
    %58 = arith.maximumf %56, %57 : vector<64x128xf32>
    %59 = vector.shape_cast %58 : vector<64x128xf32> to vector<4x16x128xf32>
    %cst_26 = arith.constant dense<0xFF800000> : vector<4x128xf32>
    %60 = vector.multi_reduction <maximumf>, %59, %cst_26 [1] : vector<4x16x128xf32> to vector<4x128xf32>
    %61 = arith.truncf %60 : vector<4x128xf32> to vector<4x128xbf16>
    %c0_27 = arith.constant 0 : index
    %c0_28 = arith.constant 0 : index
    %62 = vector.load %arg8[%c0_27, %c0_28] : memref<128x128xbf16, #tpu.memory_space<vmem>>, vector<128x128xbf16>
    %cst_29 = arith.constant dense<0.000000e+00> : vector<4x128xf32>
    %63 = tpu.matmul %61, %62, %cst_29 {dimension_numbers = #tpu.dot_dimension_numbers<[1], [0], [0], [1], [0, 0, 1, 1], [], []>} : vector<4x128xbf16>, vector<128x128xbf16>, vector<4x128xf32> -> vector<4x128xf32>
    %c0_30 = arith.constant 0 : index
    %c0_31 = arith.constant 0 : index
    %64 = vector.load %arg9[%c0_30, %c0_31] : memref<1x128xf32, #tpu.memory_space<vmem>>, vector<1x128xf32>
    %65 = vector.broadcast %64 : vector<1x128xf32> to vector<4x128xf32>
    %66 = arith.addf %63, %65 : vector<4x128xf32>
    %c0_32 = arith.constant 0 : index
    %c0_33 = arith.constant 0 : index
    %c0_34 = arith.constant 0 : index
    %67 = vector.load %arg10[%c0_32, %c0_33, %c0_34] : memref<1x4x128xf32, #tpu.memory_space<vmem>>, vector<1x4x128xf32>
    %68 = vector.shape_cast %67 : vector<1x4x128xf32> to vector<4x128xf32>
    %69 = vector.shape_cast %66 : vector<4x128xf32> to vector<1x4x128xf32>
    tpu.vector_store %arg10[%c0_32, %c0_33, %c0_34], %69 {strides = array<i32>} : memref<1x4x128xf32, #tpu.memory_space<vmem>>, vector<1x4x128xf32>,
    return
  }
  func.func @transform_0(%arg0: i32) -> (i32, i32, i32) {
    %c0_i32 = arith.constant 0 : i32
    %c0_i32_0 = arith.constant 0 : i32
    %c0_i32_1 = arith.constant 0 : i32
    return %arg0, %c0_i32, %c0_i32_0 : i32, i32, i32
  }
  func.func @transform_1(%arg0: i32) -> (i32, i32) {
    %c0_i32 = arith.constant 0 : i32
    %c0_i32_0 = arith.constant 0 : i32
    %c0_i32_1 = arith.constant 0 : i32
    return %c0_i32, %c0_i32_0 : i32, i32
  }
  func.func @transform_2(%arg0: i32) -> (i32, i32) {
    %c0_i32 = arith.constant 0 : i32
    %c0_i32_0 = arith.constant 0 : i32
    %c0_i32_1 = arith.constant 0 : i32
    return %c0_i32, %c0_i32_0 : i32, i32
  }
  func.func @transform_3(%arg0: i32) -> (i32, i32) {
    %c0_i32 = arith.constant 0 : i32
    %c0_i32_0 = arith.constant 0 : i32
    %c0_i32_1 = arith.constant 0 : i32
    return %c0_i32, %c0_i32_0 : i32, i32
  }
  func.func @transform_4(%arg0: i32) -> (i32, i32) {
    %c0_i32 = arith.constant 0 : i32
    %c0_i32_0 = arith.constant 0 : i32
    %c0_i32_1 = arith.constant 0 : i32
    return %c0_i32, %c0_i32_0 : i32, i32
  }
  func.func @transform_5(%arg0: i32) -> (i32, i32) {
    %c0_i32 = arith.constant 0 : i32
    %c0_i32_0 = arith.constant 0 : i32
    %c0_i32_1 = arith.constant 0 : i32
    return %c0_i32, %c0_i32_0 : i32, i32
  }
  func.func @transform_6(%arg0: i32) -> (i32, i32) {
    %c0_i32 = arith.constant 0 : i32
    %c0_i32_0 = arith.constant 0 : i32
    %c0_i32_1 = arith.constant 0 : i32
    return %c0_i32, %c0_i32_0 : i32, i32
  }
  func.func @transform_7(%arg0: i32) -> (i32, i32) {
    %c0_i32 = arith.constant 0 : i32
    %c0_i32_0 = arith.constant 0 : i32
    %c0_i32_1 = arith.constant 0 : i32
    return %c0_i32, %c0_i32_0 : i32, i32
  }
  func.func @transform_8(%arg0: i32) -> (i32, i32) {
    %c0_i32 = arith.constant 0 : i32
    %c0_i32_0 = arith.constant 0 : i32
    %c0_i32_1 = arith.constant 0 : i32
    return %c0_i32, %c0_i32_0 : i32, i32
  }
  func.func @transform_9(%arg0: i32) -> (i32, i32, i32) {
    %c0_i32 = arith.constant 0 : i32
    %c0_i32_0 = arith.constant 0 : i32
    %c0_i32_1 = arith.constant 0 : i32
    return %arg0, %c0_i32, %c0_i32_0 : i32, i32, i32
  }
}

</mosaic_0001>

<bundles_post_ra>
// kernel: tpu_custom_call.1
= control target key start
LH: loop header
LB: loop body
LE: loop exit
PB: predicated region body
PF: predicated region fallthrough
CT: control target
= control target key end

     0   :  { %s3081_s0 = inlined_call_operand.hbm [shape: bf16[2,64,256], index: 0, kind: input, shape index: {}]   ;;  %s3082_s1 = inlined_call_operand.hbm [shape: bf16[256,256], index: 1, kind: input, shape index: {}]   ;;  %s3083_s2 = inlined_call_operand.hbm [shape: f32[1,256], index: 2, kind: input, shape index: {}]   ;;  %s3084_s3 = inlined_call_operand.hbm [shape: bf16[256,128], index: 3, kind: input, shape index: {}]   ;;  %s3085_s4 = inlined_call_operand.vmem [shape: f32[1,128], index: 4, kind: input, shape index: {}]   ;;  %s3086_s5 = inlined_call_operand.hbm [shape: bf16[384,128], index: 5, kind: input, shape index: {}]   ;;  %s3087_s6 = inlined_call_operand.vmem [shape: f32[1,128], index: 6, kind: input, shape index: {}]   ;;  %s3088_s7 = inlined_call_operand.hbm [shape: bf16[128,128], index: 7, kind: input, shape index: {}]   ;;  %s3089_s8 = inlined_call_operand.vmem [shape: f32[1,128], index: 8, kind: input, shape index: {}]   ;;  %s3090_s9 = inlined_call_operand.hbm [shape: f32[2,4,128], index: 9, kind: output, shape index: {}]  }
   0x1   :  { %3093 = sst [smem:[#allocation19_spill]] %s3082_s1 }
   0x2   :  { %3094 = sst [smem:[#allocation20_spill]] %s3083_s2 }
   0x3   :  { %3095 = sst [smem:[#allocation21_spill]] %s3084_s3 }
   0x4   :  { %14 = vsyncpa [#allocation3], 0 }
   0x5   :  { %16 = vsyncpa [#allocation3 + $0x1], 0 }
   0x6   :  { %17 = vsyncpa [#allocation6], 0 }
   0x7   :  { %18 = vsyncpa [#allocation9], 0 }
   0x8   :  { %19 = vsyncpa [#allocation12], 0 }
   0x9   :  { %20 = vsyncpa [#allocation4], 0 }
   0xa   :  { %22 = vsyncpa [#allocation4 + $0x1], 0  ;;  %s2767_s30 = smov 0   ;;  %s2769_s10 = smov 0  }
   0xb   :  { %s2771_s11 = smov 0   ;;  %s2773_s12 = smov 0  }
   0xc LB: > { %s3096_s1 = sld [smem:[#allocation19_spill]]  ;;  %s2791_s16 = sadd.s32 4294967295, %s2706_s12   ;;  %s2706_s12 = sphi %s2773_s12, %s3111_s12   ;;  %s2702_s11 = sphi %s2771_s11, %s3110_s11   ;;  %s2698_s10 = sphi %s2769_s10, %s3109_s10   ;;  %s2694_s30 = sphi %s2767_s30, %s3108_s30  }
   0xd   : > { %p1873_p0 = scmp.ge.s32.totalorder %s2706_s12, 1  ;;  %p49_p1 = scmp.eq.s32.totalorder %s2791_s16, 0 }
   0xe   : > { %p253_p2 = scmp.lt.s32.totalorder %s2706_s12, 3  ;;  %s2708_s18 = smov [#allocation5]  }
   0xf   : > { %s266_s19 = sshll.u32 %s2708_s18, 4  ;;  %s3098_s3 = sld [smem:[#allocation21_spill]]  ;;  %s267_s19 = int_to_ptr.vmem [resolvable:$true] %s266_s19 }
  0x10   : > { %p2796_p3 = pnand %p1873_p0, %p253_p2  ;;  %s2709_s24 = smov [#allocation8]  }
  0x11   : > { %s292_s25 = sshll.u32 %s2709_s24, 4  ;;  %s3091_s26 = smov 128   ;;  %s293_s25 = int_to_ptr.vmem [resolvable:$true] %s292_s25 }
  0x12   : > { %s264_s15 = sshll.u32 %s3096_s1, 4  ;;  %p2368_p4 = pneg %p2796_p3  ;;  %s265_s15 = int_to_ptr.hbm [resolvable:$true] %s264_s15 }
  0x13   : > { %s3092_s27 = smov 8   ;;  %s2712_s28 = smov 64  }
  0x14   : > { %p2808_p6 = pnand %p2368_p4, %p49_p1  ;;  %s2713_s29 = smov 4  }
  0x15   : > { %s290_s22 = sshll.u32 %s3098_s3, 4  ;;  %s3100_s2 = sld [smem:[#allocation20_spill]]  ;;  %s291_s22 = int_to_ptr.hbm [resolvable:$true] %s290_s22 }
  0x16   : > { %2371 = dma.hbm_to_vmem [thread:$0]  (!%p2808_p6), %s265_s15, 4096, %s267_s19, [#allocation6], %s3091_s26, %s3091_s26, %s3092_s27  }
  0x17   : > { %2377 = dma.hbm_to_vmem [thread:$0]  (!%p2808_p6), %s291_s22, 2048, %s293_s25, [#allocation9], %s2712_s28, %s2712_s28, %s2713_s29  }
  0x18   : > { %s2714_s20 = smov [#allocation7]   ;;  %s307_s15 = sshll.u32 %s3086_s5, 4  ;;  %s308_s15 = int_to_ptr.hbm [resolvable:$true] %s307_s15 }
  0x19   : > { %s281_s21 = sshll.u32 %s2714_s20, 4  ;;  %s2715_s19 = smov [#allocation10]   ;;  %s282_s21 = int_to_ptr.vmem [resolvable:$true] %s281_s21 }
  0x1a   : > { %s309_s22 = sshll.u32 %s2715_s19, 4  ;;  %s324_s14 = sshll.u32 %s3088_s7, 4  ;;  %s310_s22 = int_to_ptr.vmem [resolvable:$true] %s309_s22  ;;  %s325_s14 = int_to_ptr.hbm [resolvable:$true] %s324_s14 }
  0x1b   : > { %s279_s18 = sshll.u32 %s3100_s2, 4  ;;  %s2716_s1 = smov [#allocation11]   ;;  %s280_s18 = int_to_ptr.hbm [resolvable:$true] %s279_s18 }
  0x1c   : > { %2374 = dma.hbm_to_vmem [thread:$0]  (!%p2808_p6), %s280_s18, 32, %s282_s21, [#allocation6]  }
  0x1d   : > { %2380 = dma.hbm_to_vmem [thread:$0]  (!%p2808_p6), %s308_s15, 3072, %s310_s22, [#allocation9], %s2712_s28, %s2712_s28, %s2713_s29  }
  0x1e   : > { %s326_s18 = sshll.u32 %s2716_s1, 4  ;;  %s1872_s20 = sadd.s32 4294967294, %s2706_s12   ;;  %s327_s18 = int_to_ptr.vmem [resolvable:$true] %s326_s18 }
  0x1f   : > { %2383 = dma.hbm_to_vmem [thread:$0]  (!%p2808_p6), %s325_s14, 1024, %s327_s18, [#allocation12], %s2712_s28, %s2712_s28, %s2713_s29  }
  0x20   : > { %s2836_s21 = sadd.s32 1, %s2706_s12   ;;  %s35_s24 = sadd.s32 1, %s2702_s11 }
  0x21   : > { %s32_s19 = ssub.s32 %s2706_s12, %s2836_s21  ;;  %p42_p7 = scmp.ne.s32.totalorder %s2702_s11, %s2698_s10 }
  0x22   : > { %p33_p8 = scmp.eq.s32.totalorder %s32_s19, 0  ;;  %p43_p9 = scmp.eq.s32.totalorder %s2706_s12, 0 }
  0x23   : > { %p48_p10 = scmp.ne.s32.totalorder %s2698_s10, %s2694_s30  ;;  %p240_p11 = scmp.eq.s32.totalorder %s2791_s16, 1 }
  0x24   : > { %s2848_s15 = scalar_select %p33_p8, %s2702_s11, %s35_s24  }
  0x25   : > { %p2852_p12 = por %p49_p1, %p48_p10  ;;  %p2856_p13 = por %p240_p11, %p42_p7 }
  0x26   : > { %p246_p0 = scmp.eq.s32.totalorder %s1872_s20, 1  ;;  %p44_p2 = por %p43_p9, %p42_p7 }
  0x27   : > { %s343_s29 = sand.u32 1, %s2702_s11   ;;  %p2397_p6 = scmp.lt.s32.totalorder %s2706_s12, 2 }
  0x28   : > { %p2861_p4 = por %p246_p0, %p48_p10  ;;  %s1880_s25 = sshll.u32 %s343_s29, 6 }
  0x29   : > { %s2247_s13 = sshll.u32 %s2706_s12, 6  ;;  %s347_s19 = scalar_lea.vmem [#allocation2], %s1880_s25 }
  0x2a   : > { %s352_s18 = scalar_lea.hbm %s3081_s0, %s2247_s13  ;;  %s355_s26 = sshll.u32 %s347_s19, 4  ;;  %s356_s26 = int_to_ptr.vmem [resolvable:$true] %s355_s26 }
  0x2b   : > { %s353_s24 = sshll.u32 %s352_s18, 4  ;;  %p2870_p8 = pnand %p2397_p6, %p44_p2  ;;  %s354_s24 = int_to_ptr.hbm [resolvable:$true] %s353_s24 }
  0x2c   : > { %s344_s27 = scalar_lea.sflag [#allocation3], %s343_s29  ;;  %s2598_s2 = sshra.s32 %s354_s24, 4  ;;  %s2599_s2 = int_to_ptr.hbm [resolvable:$true] %s2598_s2 }
  0x2d   : > { %s2600_s3 = scalar_lea.hbm %s2599_s2, 64  ;;  %p2602_p9 = pneg %p2870_p8 }
  0x2e   : > { %p2601_p7 = scmp.ne.s32.totalorder %s2599_s2, %s2600_s3  ;;  %s2605_s25 = scalar_lea.hbm %s3081_s0, 128 }
  0x2f   : > { %p2606_p0 = scmp.lt.s32.totalorder %s2599_s2, %s3081_s0  ;;  %p2607_p2 = scmp.lt.s32.totalorder %s2605_s25, %s2600_s3 }
  0x30   : > { %p2603_p10 = pnand %p2602_p9, %p2601_p7 }
  0x31   : > { %p2608_p6 = por %p2607_p2, %p2606_p0 }
  0x32   : > { %p2604_p11 = pneg %p2603_p10 }
  0x34   : > { %p2609_p5 = pnand %p2608_p6, %p2604_p11 }
  0x36   : > { %2612 = shalt.err (!%p2609_p5)
}
  0x37   : > { %s3105_s29 = smov 8   ;;  %s3106_s19 = smov 128  }
  0x38   : > { %2387 = dma.hbm_to_vmem [thread:$0]  (!%p2870_p8), %s354_s24, 1024, %s356_s26, %s344_s27, %s3106_s19, %s3106_s19, %s3105_s29  }
  0x39   : > { %367 = sbr.rel (%p2796_p3) target bundleno = 830 (0x33e), region = 56  ;;  %s2890_s13 = sand.u32 (!%p2796_p3), 1, %s2698_s10  }
  0x3a   : > { %s1884_s2 = sshll.u32 (!%p2796_p3), %s2890_s13, 6  ;;  %s370_s3 = scalar_lea.sflag (!%p2796_p3), [#allocation3], %s2890_s13 }
  0x3b   : > { %s2894_s14 = scalar_lea.vmem (!%p2796_p3), [#allocation2], %s1884_s2 }
  0x3e   : > { %2673 = dma.done.wait (%p2852_p12), %s370_s3, 1024  }
  0x3f   : > { %2675 = vsyncadd (%p2852_p12), %s370_s3, 4294966272 }
  0x40   : > { %2677 = dma.done.wait (%p49_p1), [#allocation6], 4128  }
  0x41   : > { %2679 = vsyncadd (%p49_p1), [#allocation6], 4294963168 }
  0x42   : > { %2681 = dma.done.wait (%p49_p1), [#allocation9], 5120  }
  0x43   : > { %2683 = vsyncadd (%p49_p1), [#allocation9], 4294962176 }
  0x44   : > { %2685 = dma.done.wait (%p49_p1), [#allocation12], 1024  }
  0x45   : > { %2687 = vsyncadd (%p49_p1), [#allocation12], 4294966272  ;;  %v1981_v0 = vld [vmem:[#allocation5 + $0x70] sm:$0xf]  ;;  %v2271_v1 = vld [vmem:[#allocation5 + $0x74] sm:$0xf0] }
  0x46   : > { %v2045_v2 = vld [vmem:[#allocation5 + $0xf0] sm:$0xf]  ;;  %v1982_v3 = vor.u32 %v2271_v1, %v1981_v0  ;;  %v2287_v4 = vld [vmem:[#allocation5 + $0xf4] sm:$0xf0]  ;;  %v1973_v5 = vld [vmem:[#allocation5 + $0x60] sm:$0xf] }
  0x47   : > { %v2269_v6 = vld [vmem:[#allocation5 + $0x64] sm:$0xf0]  ;;  %v2046_v7 = vor.u32 %v2287_v4, %v2045_v2  ;;  %v2037_v8 = vld [vmem:[#allocation5 + $0xe0] sm:$0xf]  ;;  %v1965_v12 = vld [vmem:[#allocation5 + $0x50] sm:$0xf] }
  0x48   : > { %v2285_v9 = vld [vmem:[#allocation5 + $0xe4] sm:$0xf0]  ;;  %680 = vmatpush.bf16.msra.mxu0 %v1982_v3  ;;  %2336 = vmatpush.bf16.msra.mxu2 %v1982_v3  ;;  %v1974_v10 = vor.u32 %v2269_v6, %v1973_v5  ;;  %v2267_v13 = vld [vmem:[#allocation5 + $0x54] sm:$0xf0]  ;;  %v2029_v14 = vld [vmem:[#allocation5 + $0xd0] sm:$0xf] }
  0x49   : > { %709 = vmatpush.bf16.msra.mxu1 %v2046_v7  ;;  %v2038_v11 = vor.u32 %v2285_v9, %v2037_v8  ;;  %v2283_v15 = vld [vmem:[#allocation5 + $0xd4] sm:$0xf0]  ;;  %v1966_v16 = vor.u32 %v2267_v13, %v1965_v12  ;;  %v1957_v18 = vld [vmem:[#allocation5 + $0x40] sm:$0xf]  ;;  %v2265_v19 = vld [vmem:[#allocation5 + $0x44] sm:$0xf0] }
  0x4a   : > { %v2030_v17 = vor.u32 %v2283_v15, %v2029_v14  ;;  %v2021_v20 = vld [vmem:[#allocation5 + $0xc0] sm:$0xf]  ;;  %v2281_v21 = vld [vmem:[#allocation5 + $0xc4] sm:$0xf0]  ;;  %v2286_v22 = vld [vmem:[#allocation5 + $0xf4] sm:$0xf]  ;;  %v1958_v25 = vor.u32 %v2265_v19, %v1957_v18 }
  0x4b   : > { %v2047_v23 = vld [vmem:[#allocation5 + $0xf8] sm:$0xf0]  ;;  %v2284_v26 = vld [vmem:[#allocation5 + $0xe4] sm:$0xf]  ;;  %v2039_v27 = vld [vmem:[#allocation5 + $0xe8] sm:$0xf0]  ;;  %v2022_v28 = vor.u32 %v2281_v21, %v2021_v20 }
  0x4c   : > { %681 = vmatpush.bf16.msra.mxu0 %v1974_v10  ;;  %2337 = vmatpush.bf16.msra.mxu2 %v1974_v10  ;;  %v2050_v24 = vor.u32 %v2286_v22, %v2047_v23  ;;  %v1949_v29 = vld [vmem:[#allocation5 + $0x30] sm:$0xf]  ;;  %v2263_v30 = vld [vmem:[#allocation5 + $0x34] sm:$0xf0]  ;;  %v2042_v31 = vor.u32 %v2284_v26, %v2039_v27  ;;  %v2282_v34 = vld [vmem:[#allocation5 + $0xd4] sm:$0xf] }
  0x4d   : > { %710 = vmatpush.bf16.msra.mxu1 %v2038_v11  ;;  %v2013_v32 = vld [vmem:[#allocation5 + $0xb0] sm:$0xf]  ;;  %v2279_v33 = vld [vmem:[#allocation5 + $0xb4] sm:$0xf0]  ;;  %v1950_v35 = vor.u32 %v2263_v30, %v1949_v29  ;;  %v2031_v36 = vld [vmem:[#allocation5 + $0xd8] sm:$0xf0] }
  0x4e   : > { %767 = vmatpush.bf16.msra.mxu3 %v2050_v24  ;;  %v2014_v37 = vor.u32 %v2279_v33, %v2013_v32  ;;  %v1941_v38 = vld [vmem:[#allocation5 + $0x20] sm:$0xf]  ;;  %v2261_v39 = vld [vmem:[#allocation5 + $0x24] sm:$0xf0]  ;;  %v2034_v41 = vor.u32 %v2282_v34, %v2031_v36  ;;  %v2280_v43 = vld [vmem:[#allocation5 + $0xc4] sm:$0xf] }
  0x4f   : > { %v2005_v40 = vld [vmem:[#allocation5 + $0xa0] sm:$0xf]  ;;  %v2277_v42 = vld [vmem:[#allocation5 + $0xa4] sm:$0xf0]  ;;  %v2023_v44 = vld [vmem:[#allocation5 + $0xc8] sm:$0xf0]  ;;  %v1942_v45 = vor.u32 %v2261_v39, %v1941_v38 }
  0x50   : > { %682 = vmatpush.bf16.msra.mxu0 %v1966_v16  ;;  %2338 = vmatpush.bf16.msra.mxu2 %v1966_v16  ;;  %v2006_v46 = vor.u32 %v2277_v42, %v2005_v40  ;;  %v1933_v47 = vld [vmem:[#allocation5 + $0x10] sm:$0xf]  ;;  %v2259_v48 = vld [vmem:[#allocation5 + $0x14] sm:$0xf0]  ;;  %v2026_v50 = vor.u32 %v2280_v43, %v2023_v44  ;;  %v2278_v52 = vld [vmem:[#allocation5 + $0xb4] sm:$0xf] }
  0x51   : > { %711 = vmatpush.bf16.msra.mxu1 %v2030_v17  ;;  %v1997_v49 = vld [vmem:[#allocation5 + $0x90] sm:$0xf]  ;;  %v2275_v51 = vld [vmem:[#allocation5 + $0x94] sm:$0xf0]  ;;  %v2015_v53 = vld [vmem:[#allocation5 + $0xb8] sm:$0xf0]  ;;  %v1934_v54 = vor.u32 %v2259_v48, %v1933_v47 }
  0x52   : > { %768 = vmatpush.bf16.msra.mxu3 %v2042_v31  ;;  %v1925_v55 = vld [vmem:[#allocation5] sm:$0xf]  ;;  %v2257_v56 = vld [vmem:[#allocation5 + $0x4] sm:$0xf0]  ;;  %v1998_v57 = vor.u32 %v2275_v51, %v1997_v49  ;;  %v2270_v60 = vld [vmem:[#allocation5 + $0x74] sm:$0xf]  ;;  %v2018_v61 = vor.u32 %v2278_v52, %v2015_v53 }
  0x53   : > { %v1989_v58 = vld [vmem:[#allocation5 + $0x80] sm:$0xf]  ;;  %v2273_v59 = vld [vmem:[#allocation5 + $0x84] sm:$0xf0]  ;;  %v1983_v63 = vld [vmem:[#allocation5 + $0x78] sm:$0xf0]  ;;  %v1926_v2 = vor.u32 %v2257_v56, %v1925_v55 }
  0x54   : > { %683 = vmatpush.bf16.msra.mxu0 %v1958_v25  ;;  %2339 = vmatpush.bf16.msra.mxu2 %v1958_v25  ;;  %v1893_v62 = vld [vmem:[%s2894_s14] sm:$0xf]  ;;  %v2276_v0 = vld [vmem:[#allocation5 + $0xa4] sm:$0xf]  ;;  %v2007_v1 = vld [vmem:[#allocation5 + $0xa8] sm:$0xf0]  ;;  %v1990_v6 = vor.u32 %v2273_v59, %v1989_v58  ;;  %v1986_v9 = vor.u32 %v2270_v60, %v1983_v63 }
  0x55   : > { %712 = vmatpush.bf16.msra.mxu1 %v2022_v28  ;;  %v2249_v3 = vld [vmem:[%s2894_s14 + $0x4] sm:$0xf0]  ;;  %v1909_v4 = vld [vmem:[%s2894_s14 + $0x20] sm:$0xf]  ;;  %v2248_v7 = vld [vmem:[%s2894_s14 + $0x4] sm:$0xf]  ;;  %v2010_v12 = vor.u32 %v2276_v0, %v2007_v1 }
  0x56   : > { %769 = vmatpush.bf16.msra.mxu3 %v2034_v41  ;;  %v2253_v5 = vld [vmem:[%s2894_s14 + $0x24] sm:$0xf0]  ;;  %v1895_v8 = vld [vmem:[%s2894_s14 + $0x8] sm:$0xf0]  ;;  %v2268_v10 = vld [vmem:[#allocation5 + $0x64] sm:$0xf]  ;;  %v1894_v13 = vor.u32 %v2249_v3, %v1893_v62 }
  0x57   : > { %v1975_v11 = vld [vmem:[#allocation5 + $0x68] sm:$0xf0]  ;;  %v2918_v14 = vor.u32 %v2253_v5, %v1909_v4  ;;  %v2274_v15 = vld [vmem:[#allocation5 + $0x94] sm:$0xf]  ;;  %v1999_v16 = vld [vmem:[#allocation5 + $0x98] sm:$0xf0]  ;;  %v1898_v17 = vor.u32 %v2248_v7, %v1895_v8 }
  0x58   : > { %684 = vmatpush.bf16.msra.mxu0 %v1950_v35  ;;  %2340 = vmatpush.bf16.msra.mxu2 %v1950_v35  ;;  %v1978_v18 = vor.u32 %v2268_v10, %v1975_v11  ;;  %v2266_v19 = vld [vmem:[#allocation5 + $0x54] sm:$0xf]  ;;  %v1967_v20 = vld [vmem:[#allocation5 + $0x58] sm:$0xf0]  ;;  %v2002_v21 = vor.u32 %v2274_v15, %v1999_v16  ;;  %v2272_v22 = vld [vmem:[#allocation5 + $0x84] sm:$0xf] }
  0x59   : > { %713 = vmatpush.bf16.msra.mxu1 %v2014_v37  ;;  %v1991_v23 = vld [vmem:[#allocation5 + $0x88] sm:$0xf0]  ;;  %v1970_v24 = vor.u32 %v2266_v19, %v1967_v20  ;;  %v2264_v25 = vld [vmem:[#allocation5 + $0x44] sm:$0xf]  ;;  %v2262_v29 = vld [vmem:[#allocation5 + $0x34] sm:$0xf] }
  0x5a   : > { %770 = vmatpush.bf16.msra.mxu3 %v2026_v50  ;;  %v1959_v26 = vld [vmem:[#allocation5 + $0x48] sm:$0xf0]  ;;  %v1994_v27 = vor.u32 %v2272_v22, %v1991_v23  ;;  %v1951_v30 = vld [vmem:[#allocation5 + $0x38] sm:$0xf0]  ;;  %v1901_v31 = vld [vmem:[%s2894_s14 + $0x10] sm:$0xf] }
  0x5b   : > { %v1962_v28 = vor.u32 %v2264_v25, %v1959_v26  ;;  %v2251_v32 = vld [vmem:[%s2894_s14 + $0x14] sm:$0xf0]  ;;  %v1917_v33 = vld [vmem:[%s2894_s14 + $0x30] sm:$0xf]  ;;  %v2250_v35 = vld [vmem:[%s2894_s14 + $0x14] sm:$0xf]  ;;  %v1954_v37 = vor.u32 %v2262_v29, %v1951_v30 }
  0x5c   : > { %685 = vmatpush.bf16.msra.mxu0 %v1942_v45  ;;  %2341 = vmatpush.bf16.msra.mxu2 %v1942_v45  ;;  %v2255_v34 = vld [vmem:[%s2894_s14 + $0x34] sm:$0xf0]  ;;  %v1903_v36 = vld [vmem:[%s2894_s14 + $0x18] sm:$0xf0]  ;;  %v2260_v38 = vld [vmem:[#allocation5 + $0x24] sm:$0xf]  ;;  %v1902_v40 = vor.u32 %v2251_v32, %v1901_v31 }
  0x5d   : > { %714 = vmatpush.bf16.msra.mxu1 %v2006_v46  ;;  %v1943_v39 = vld [vmem:[#allocation5 + $0x28] sm:$0xf0]  ;;  %v1918_v41 = vor.u32 %v2255_v34, %v1917_v33  ;;  %v1906_v42 = vor.u32 %v2250_v35, %v1903_v36  ;;  %v2258_v44 = vld [vmem:[#allocation5 + $0x14] sm:$0xf]  ;;  %v1935_v45 = vld [vmem:[#allocation5 + $0x18] sm:$0xf0] }
  0x5e   : > { %771 = vmatpush.bf16.msra.mxu3 %v2018_v61  ;;  %v1946_v43 = vor.u32 %v2260_v38, %v1943_v39  ;;  %v1938_v46 = vor.u32 %v2258_v44, %v1935_v45  ;;  %v2256_v47 = vld [vmem:[#allocation5 + $0x4] sm:$0xf]  ;;  %v1927_v48 = vld [vmem:[#allocation5 + $0x8] sm:$0xf0]  ;;  %v2254_v53 = vld [vmem:[%s2894_s14 + $0x34] sm:$0xf] }
  0x5f   : > { %v1930_v49 = vor.u32 %v2256_v47, %v1927_v48  ;;  %v2252_v50 = vld [vmem:[%s2894_s14 + $0x24] sm:$0xf]  ;;  %v1911_v51 = vld [vmem:[%s2894_s14 + $0x28] sm:$0xf0]  ;;  %v2295_v56 = vld [vmem:[#allocation8 + $0x38] sm:$0xff]  ;;  %vm1668_vm10 = vcmask 1041409  }
  0x60   : > { %686 = vmatpush.bf16.msra.mxu0 %v1934_v54  ;;  %2342 = vmatpush.bf16.msra.mxu2 %v1934_v54  ;;  %v1914_v52 = vor.u32 %v2252_v50, %v1911_v51  ;;  %v1919_v54 = vld [vmem:[%s2894_s14 + $0x38] sm:$0xf0]  ;;  %v2294_v58 = vld [vmem:[#allocation8 + $0x30] sm:$0xff]  ;;  %v2293_v60 = vld [vmem:[#allocation8 + $0x28] sm:$0xff]  ;;  %vm1670_vm11 = vcmask 1042434   ;;  %vm1672_vm12 = vcmask 1043459  }
  0x61   : > { %715 = vmatpush.bf16.msra.mxu1 %v1998_v57  ;;  %v1922_v55 = vor.u32 %v2254_v53, %v1919_v54  ;;  %v2303_v57 = vld [vmem:[#allocation8 + $0x78] sm:$0xff]  ;;  %v2302_v59 = vld [vmem:[#allocation8 + $0x70] sm:$0xff]  ;;  %v2292_v61 = vld [vmem:[#allocation8 + $0x20] sm:$0xff]  ;;  %s2244_s24 = sshll.u32 %s2791_s16, 2  ;;  %s1890_s20 = sshll.u32 %s2890_s13, 2 }
  0x62   : > { %772 = vmatpush.bf16.msra.mxu3 %v2010_v12  ;;  %v2291_v62 = vld [vmem:[#allocation8 + $0x18] sm:$0xff]  ;;  %v2290_v63 = vld [vmem:[#allocation8 + $0x10] sm:$0xff]  ;;  %v2301_v0 = vld [vmem:[#allocation8 + $0x68] sm:$0xff]  ;;  %s1749_s18 = scalar_lea.hbm %s3090_s9, %s2244_s24  ;;  %s433_s2 = scalar_lea.vmem [#allocation13], %s1890_s20 }
  0x63   : > { %v2289_v1 = vld [vmem:[#allocation8 + $0x8] sm:$0xff]  ;;  %v2300_v3 = vld [vmem:[#allocation8 + $0x60] sm:$0xff]  ;;  %v2299_v4 = vld [vmem:[#allocation8 + $0x58] sm:$0xff]  ;;  %s1751_s3 = sshll.u32 %s433_s2, 4  ;;  %s1753_s14 = sshll.u32 %s1749_s18, 4  ;;  %s1752_s3 = int_to_ptr.vmem [resolvable:$true] %s1751_s3  ;;  %s1754_s14 = int_to_ptr.hbm [resolvable:$true] %s1753_s14 }
  0x64   : > { %687 = vmatpush.bf16.msra.mxu0 %v1926_v2  ;;  %2343 = vmatpush.bf16.msra.mxu2 %v1926_v2  ;;  %v2288_v2 = vld [vmem:[#allocation8] sm:$0xff]  ;;  %v474_v5 = vld [vmem:[#allocation7] sm:$0x3]  ;;  %s1739_s17 = scalar_lea.sflag [#allocation4], %s2890_s13  ;;  %s2642_s16 = sshra.s32 %s1754_s14, 4  ;;  %s2643_s16 = int_to_ptr.hbm [resolvable:$true] %s2642_s16 }
  0x65   : > { %716 = vmatpush.bf16.msra.mxu1 %v1990_v6  ;;  %v2298_v6 = vld [vmem:[#allocation8 + $0x50] sm:$0xff]  ;;  %v476_v8 = vperm.slane %v474_v5, 0  ;;  %v2296_v25 = vld [vmem:[#allocation8 + $0x40] sm:$0xff]  ;;  %s2644_s26 = scalar_lea.hbm %s2643_s16, 4  ;;  %s2648_s24 = scalar_lea.hbm %s3090_s9, 8 }
  0x66   : > { %773 = vmatpush.bf16.msra.mxu3 %v2002_v21  ;;  %p2645_p1 = scmp.ne.s32.totalorder %s2643_s16, %s2644_s26  ;;  %p2649_p12 = scmp.lt.s32.totalorder %s2643_s16, %s3090_s9 }
  0x67   : > { %688 = vmatmul.bf16.vlgmr.msra.gmra.mxu0 %v1894_v13  ;;  %698 = vmatmul.bf16.vlgmr.msra.gmra.mxu2 %v2918_v14  ;;  %p2650_p8 = scmp.lt.s32.totalorder %s2648_s24, %s2644_s26 }
  0x68   : > { %738 = vmatpush.bf16.msrb.mxu2 %v1986_v9  ;;  %717 = vmatmul.bf16.vlgmr.msra.gmra.mxu1 %v1898_v17  ;;  %p2646_p3 = pnand %p2645_p1, %p2856_p13 }
  0x69   : > { %952 = vmatpush.bf16.msrb.mxu0 %v2295_v56  ;;  %981 = vmatpush.bf16.msrb.mxu1 %v2303_v57  ;;  %p2651_p7 = por %p2650_p8, %p2649_p12 }
  0x6a   : > { %774 = vmatpush.bf16.msra.mxu3 %v1994_v27  ;;  %p2647_p5 = pneg %p2646_p3 }
  0x6c   : > { %739 = vmatpush.bf16.msrb.mxu2 %v1978_v18  ;;  %v2297_v18 = vld [vmem:[#allocation8 + $0x48] sm:$0xff]  ;;  %p2652_p9 = pnand %p2651_p7, %p2647_p5 }
  0x6d   : > { %775 = vmatmul.bf16.vlgmr.msra.gmra.mxu3 %v1898_v17  ;;  %953 = vmatpush.bf16.msrb.mxu0 %v2294_v58 }
  0x6e   : > { %982 = vmatpush.bf16.msrb.mxu1 %v2302_v59 }
  0x70   : > { %740 = vmatpush.bf16.msrb.mxu2 %v1970_v24 }
  0x71   : > { %954 = vmatpush.bf16.msrb.mxu0 %v2293_v60 }
  0x72   : > { %983 = vmatpush.bf16.msrb.mxu1 %v2301_v0 }
  0x74   : > { %741 = vmatpush.bf16.msrb.mxu2 %v1962_v28 }
  0x75   : > { %955 = vmatpush.bf16.msrb.mxu0 %v2292_v61 }
  0x76   : > { %984 = vmatpush.bf16.msrb.mxu1 %v2300_v3 }
  0x77   : > { %693 = vmatmul.bf16.gmra.mxu0 %v1902_v40  ;;  %703 = vmatmul.bf16.gmra.mxu2 %v1918_v41 }
  0x78   : > { %742 = vmatpush.bf16.msrb.mxu2 %v1954_v37  ;;  %722 = vmatmul.bf16.gmra.mxu1 %v1906_v42 }
  0x79   : > { %956 = vmatpush.bf16.msrb.mxu0 %v2291_v62 }
  0x7a   : > { %985 = vmatpush.bf16.msrb.mxu1 %v2299_v4 }
  0x7c   : > { %743 = vmatpush.bf16.msrb.mxu2 %v1946_v43 }
  0x7d   : > { %780 = vmatmul.bf16.gmra.mxu3 %v1906_v42  ;;  %957 = vmatpush.bf16.msrb.mxu0 %v2290_v63 }
  0x7e   : > { %986 = vmatpush.bf16.msrb.mxu1 %v2298_v6 }
  0x80   : > { %744 = vmatpush.bf16.msrb.mxu2 %v1938_v46 }
  0x81   : > { %958 = vmatpush.bf16.msrb.mxu0 %v2289_v1 }
  0x82   : > { %987 = vmatpush.bf16.msrb.mxu1 %v2297_v18 }
  0x84   : > { %745 = vmatpush.bf16.msrb.mxu2 %v1930_v49 }
  0x85   : > { %959 = vmatpush.bf16.msrb.mxu0 %v2288_v2 }
  0x86   : > { %988 = vmatpush.bf16.msrb.mxu1 %v2296_v25 }
  0x87   : > { %746 = vmatmul.bf16.vlgmr.msrb.gmra.mxu2 %v1894_v13 }
  0x88   : > { %727 = vmatmul.bf16.gmra.mxu1 %v1914_v52 }
  0x8d   : > { %785 = vmatmul.bf16.gmra.mxu3 %v1914_v52 }
  0x97   : > { %751 = vmatmul.bf16.gmra.mxu2 %v1902_v40 }
  0x98   : > { %732 = vmatmul.bf16.gmra.mxu1 %v1922_v55 }
  0x9d   : > { %790 = vmatmul.bf16.gmra.mxu3 %v1922_v55 }
  0xa7   : > { %756 = vmatmul.bf16.gmra.mxu2 %v2918_v14 }
  0xb7   : > { %761 = vmatmul.bf16.gmra.mxu2 %v1918_v41  ;;  %v477_v41 = vperm.slane %v474_v5, 1 }
  0xe4   : > { %v689_v7 = vpop.f32.mrf.mxu0 }
  0xe5   : > { %v718_v9 = vpop.f32.mrf.mxu1  ;;  %v690_v10 = vadd.f32 %v689_v7, %v476_v8 }
  0xe7   : > { %v719_v12 = vadd.f32 %v718_v9, %v690_v10 }
  0xe9   : > { %v796_v16 = vmax.f32 %v719_v12, 0.0 }
  0xea   : > { %v699_v11 = vpop.f32.mrf.mxu2 }
  0xeb   : > { %v700_v40 = vadd.f32 %v699_v11, %v476_v8 }
  0xec   : > { %v691_v13 = vpop.f32.mrf.mxu0 }
  0xed   : > { %v692_v14 = vadd.f32 %v691_v13, %v476_v8  ;;  %v720_v15 = vpop.f32.mrf.mxu1 }
  0xef   : > { %v721_v17 = vadd.f32 %v720_v15, %v692_v14 }
  0xf0   : > { %v776_v31 = vpop.f32.mrf.mxu3 }
  0xf1   : > { %v798_v19 = vmax.f32 %v721_v17, 0.0 }
  0xf2   : > { %v701_v20 = vpop.f32.mrf.mxu2 }
  0xf3   : > { %v812_v21 = vpack.c.bf16 %v798_v19, %v796_v16  ;;  %v702_v42 = vadd.f32 %v701_v20, %v476_v8 }
  0xf4   : > { %v694_v22 = vpop.f32.mrf.mxu0 }
  0xf5   : > { %v723_v23 = vpop.f32.mrf.mxu1  ;;  %960 = vmatmul.bf16.vlgmr.msrb.gmra.mxu0 %v812_v21  ;;  %v695_v24 = vadd.f32 %v694_v22, %v476_v8 }
  0xf7   : > { %v724_v27 = vadd.f32 %v723_v23, %v695_v24 }
  0xf8   : > { %v778_v38 = vpop.f32.mrf.mxu3 }
  0xf9   : > { %v800_v32 = vmax.f32 %v724_v27, 0.0 }
  0xfa   : > { %v704_v26 = vpop.f32.mrf.mxu2 }
  0xfb   : > { %v705_v60 = vadd.f32 %v704_v26, %v476_v8 }
  0xfc   : > { %v696_v28 = vpop.f32.mrf.mxu0 }
  0xfd   : > { %v697_v29 = vadd.f32 %v696_v28, %v476_v8  ;;  %v725_v30 = vpop.f32.mrf.mxu1 }
  0xff   : > { %v726_v33 = vadd.f32 %v725_v30, %v697_v29 }
 0x100   : > { %v781_v50 = vpop.f32.mrf.mxu3 }
 0x101   : > { %v802_v34 = vmax.f32 %v726_v33, 0.0 }
 0x102   : > { %v706_v35 = vpop.f32.mrf.mxu2 }
 0x103   : > { %v814_v36 = vpack.c.bf16 %v802_v34, %v800_v32  ;;  %v707_v61 = vadd.f32 %v706_v35, %v476_v8  ;;  %v2319_v35 = vld [vmem:[#allocation10 + $0x78] sm:$0xff] }
 0x104   : > { %1542 = vmatpush.bf16.msrb.mxu3 %v2319_v35 }
 0x105   : > { %v728_v37 = vpop.f32.mrf.mxu1  ;;  %965 = vmatmul.bf16.gmra.mxu0 %v814_v36  ;;  %v2318_v36 = vld [vmem:[#allocation10 + $0x70] sm:$0xff] }
 0x106   : > { %v729_v43 = vadd.f32 %v728_v37, %v700_v40  ;;  %v2317_v37 = vld [vmem:[#allocation10 + $0x68] sm:$0xff]  ;;  %v2315_v40 = vld [vmem:[#allocation10 + $0x58] sm:$0xff] }
 0x108   : > { %v804_v48 = vmax.f32 %v729_v43, 0.0  ;;  %v783_v62 = vpop.f32.mrf.mxu3  ;;  %1543 = vmatpush.bf16.msrb.mxu3 %v2318_v36  ;;  %v2314_v43 = vld [vmem:[#allocation10 + $0x50] sm:$0xff] }
 0x10a   : > { %v747_v39 = vpop.f32.mrf.mxu2 }
 0x10b   : > { %v748_v46 = vadd.f32 %v747_v39, %v477_v41  ;;  %v2327_v39 = vld [vmem:[#allocation10 + $0xb8] sm:$0xff] }
 0x10c   : > { %1544 = vmatpush.bf16.msrb.mxu3 %v2317_v37  ;;  %1571 = vmatpush.bf16.msra.mxu0 %v2327_v39 }
 0x10d   : > { %v730_v44 = vpop.f32.mrf.mxu1  ;;  %v777_v51 = vadd.f32 %v776_v31, %v748_v46  ;;  %v2324_v46 = vld [vmem:[#allocation10 + $0xa0] sm:$0xff] }
 0x10e   : > { %v731_v45 = vadd.f32 %v730_v44, %v702_v42  ;;  %v2326_v42 = vld [vmem:[#allocation10 + $0xb0] sm:$0xff]  ;;  %v2325_v44 = vld [vmem:[#allocation10 + $0xa8] sm:$0xff] }
 0x10f   : > { %v797_v56 = vmax.f32 %v777_v51, 0.0  ;;  %v2322_v51 = vld [vmem:[#allocation10 + $0x90] sm:$0xff] }
 0x110   : > { %v806_v47 = vmax.f32 %v731_v45, 0.0  ;;  %v786_v11 = vpop.f32.mrf.mxu3  ;;  %1572 = vmatpush.bf16.msra.mxu0 %v2326_v42  ;;  %v2313_v45 = vld [vmem:[#allocation10 + $0x48] sm:$0xff] }
 0x112   : > { %v749_v49 = vpop.f32.mrf.mxu2  ;;  %v816_v53 = vpack.c.bf16 %v806_v47, %v804_v48  ;;  %v2310_v48 = vld [vmem:[#allocation10 + $0x30] sm:$0xff] }
 0x113   : > { %v750_v52 = vadd.f32 %v749_v49, %v477_v41  ;;  %v2312_v49 = vld [vmem:[#allocation10 + $0x40] sm:$0xff] }
 0x114   : > { %1573 = vmatpush.bf16.msra.mxu0 %v2325_v44 }
 0x115   : > { %v779_v54 = vadd.f32 %v778_v38, %v750_v52  ;;  %v733_v55 = vpop.f32.mrf.mxu1  ;;  %970 = vmatmul.bf16.gmra.mxu0 %v816_v53  ;;  %v2316_v38 = vld [vmem:[#allocation10 + $0x60] sm:$0xff]  ;;  %v2309_v52 = vld [vmem:[#allocation10 + $0x28] sm:$0xff] }
 0x116   : > { %v734_v63 = vadd.f32 %v733_v55, %v705_v60  ;;  %1545 = vmatpush.bf16.msrb.mxu3 %v2316_v38  ;;  %v2321_v53 = vld [vmem:[#allocation10 + $0x88] sm:$0xff]  ;;  %v2320_v55 = vld [vmem:[#allocation10 + $0x80] sm:$0xff] }
 0x117   : > { %v799_v57 = vmax.f32 %v779_v54, 0.0 }
 0x118   : > { %v808_v4 = vmax.f32 %v734_v63, 0.0  ;;  %v788_v16 = vpop.f32.mrf.mxu3  ;;  %1574 = vmatpush.bf16.msra.mxu0 %v2324_v46 }
 0x119   : > { %v813_v58 = vpack.c.bf16 %v799_v57, %v797_v56  ;;  %v2935_v56 = vld [vmem:[%s3085_s4] ss:$0 sm:$0xff]  ;;  %v2308_v57 = vld [vmem:[#allocation10 + $0x20] sm:$0xff] }
 0x11a   : > { %v752_v59 = vpop.f32.mrf.mxu2  ;;  %1546 = vmatpush.bf16.msrb.mxu3 %v2315_v40 }
 0x11b   : > { %989 = vmatmul.bf16.vlgmr.msrb.gmra.mxu1 %v813_v58  ;;  %v753_v2 = vadd.f32 %v752_v59, %v477_v41 }
 0x11d   : > { %v735_v0 = vpop.f32.mrf.mxu1  ;;  %v782_v6 = vadd.f32 %v781_v50, %v753_v2  ;;  %v2323_v50 = vld [vmem:[#allocation10 + $0x98] sm:$0xff] }
 0x11e   : > { %v736_v1 = vadd.f32 %v735_v0, %v707_v61  ;;  %1547 = vmatpush.bf16.msrb.mxu3 %v2314_v43  ;;  %1575 = vmatpush.bf16.msra.mxu0 %v2323_v50 }
 0x11f   : > { %v801_v12 = vmax.f32 %v782_v6, 0.0 }
 0x120   : > { %v810_v3 = vmax.f32 %v736_v1, 0.0  ;;  %v791_v24 = vpop.f32.mrf.mxu3  ;;  %v1018_v1 = vlaneseq }
 0x122   : > { %v754_v5 = vpop.f32.mrf.mxu2  ;;  %v818_v9 = vpack.c.bf16 %v810_v3, %v808_v4  ;;  %1548 = vmatpush.bf16.msrb.mxu3 %v2313_v45  ;;  %1576 = vmatpush.bf16.msra.mxu0 %v2322_v51  ;;  %v2945_v6 = vshrl.u32 %v1018_v1, 7 }
 0x123   : > { %v755_v7 = vadd.f32 %v754_v5, %v477_v41 }
 0x124   : > { %vm1188_vm0 = vcmp.lt.s32.totalorder %v2945_v6, 7  ;;  %v1022_v38 = vadd.s32 24, %v2945_v6  ;;  %vm1139_vm4 = vcmp.lt.s32.totalorder %v2945_v6, 1 }
 0x125   : > { %v784_v10 = vadd.f32 %v783_v62, %v755_v7  ;;  %975 = vmatmul.bf16.gmra.mxu0 %v818_v9  ;;  %v2307_v62 = vld [vmem:[#allocation10 + $0x18] sm:$0xff] }
 0x126   : > { %1549 = vmatpush.bf16.msrb.mxu3 %v2312_v49  ;;  %1577 = vmatpush.bf16.msra.mxu0 %v2321_v53 }
 0x127   : > { %v803_v13 = vmax.f32 %v784_v10, 0.0  ;;  %v1020_v10 = vadd.s32 8, %v2945_v6 }
 0x128   : > { %v793_v30 = vpop.f32.mrf.mxu3 }
 0x129   : > { %v815_v14 = vpack.c.bf16 %v803_v13, %v801_v12 }
 0x12a   : > { %v757_v15 = vpop.f32.mrf.mxu2  ;;  %1578 = vmatpush.bf16.msra.mxu0 %v2320_v55 }
 0x12b   : > { %994 = vmatmul.bf16.gmra.mxu1 %v815_v14  ;;  %v758_v8 = vadd.f32 %v757_v15, %v477_v41 }
 0x12d   : > { %v787_v18 = vadd.f32 %v786_v11, %v758_v8  ;;  %v2306_v11 = vld [vmem:[#allocation10 + $0x10] sm:$0xff] }
 0x12f   : > { %v805_v21 = vmax.f32 %v787_v18, 0.0  ;;  %v1038_v18 = vand.u32 15, %v1020_v10 }
 0x131   : > { %vm1173_vm1 = vcmp.ne.s32.totalorder %v1038_v18, 15 }
 0x132   : > { %v759_v17 = vpop.f32.mrf.mxu2 }
 0x133   : > { %v760_v19 = vadd.f32 %v759_v17, %v477_v41 }
 0x135   : > { %v789_v20 = vadd.f32 %v788_v16, %v760_v19 }
 0x137   : > { %v807_v22 = vmax.f32 %v789_v20, 0.0 }
 0x139   : > { %v817_v23 = vpack.c.bf16 %v807_v22, %v805_v21 }
 0x13a   : > { %v762_v25 = vpop.f32.mrf.mxu2 }
 0x13b   : > { %999 = vmatmul.bf16.gmra.mxu1 %v817_v23  ;;  %v763_v26 = vadd.f32 %v762_v25, %v477_v41  ;;  %v2305_v23 = vld [vmem:[#allocation10 + $0x8] sm:$0xff] }
 0x13d   : > { %v792_v28 = vadd.f32 %v791_v24, %v763_v26 }
 0x13f   : > { %v809_v32 = vmax.f32 %v792_v28, 0.0 }
 0x142   : > { %v764_v27 = vpop.f32.mrf.mxu2 }
 0x143   : > { %v765_v29 = vadd.f32 %v764_v27, %v477_v41  ;;  %v2311_v41 = vld [vmem:[#allocation10 + $0x38] sm:$0xff] }
 0x144   : > { %1513 = vmatpush.bf16.msra.mxu2 %v2311_v41  ;;  %v2304_v41 = vld [vmem:[#allocation10] sm:$0xff] }
 0x145   : > { %v794_v31 = vadd.f32 %v793_v30, %v765_v29 }
 0x147   : > { %v811_v33 = vmax.f32 %v794_v31, 0.0 }
 0x148   : > { %1514 = vmatpush.bf16.msra.mxu2 %v2310_v48  ;;  %v1052_v48 = vand.u32 15, %v1022_v38 }
 0x149   : > { %v819_v34 = vpack.c.bf16 %v811_v33, %v809_v32 }
 0x14a   : > { %vm1175_vm2 = vcmp.ne.s32.totalorder %v1052_v48, 15 }
 0x14b   : > { %1004 = vmatmul.bf16.gmra.mxu1 %v819_v34 }
 0x14c   : > { %1515 = vmatpush.bf16.msra.mxu2 %v2309_v52 }
 0x150   : > { %1516 = vmatpush.bf16.msra.mxu2 %v2308_v57 }
 0x154   : > { %1517 = vmatpush.bf16.msra.mxu2 %v2307_v62 }
 0x158   : > { %1518 = vmatpush.bf16.msra.mxu2 %v2306_v11 }
 0x15c   : > { %1519 = vmatpush.bf16.msra.mxu2 %v2305_v23 }
 0x160   : > { %1520 = vmatpush.bf16.msra.mxu2 %v2304_v41 }
 0x172   : > { %v961_v47 = vpop.f32.mrf.mxu0 }
 0x173   : > { %v962_v59 = vadd.f32 %v2935_v56, %v961_v47 }
 0x17a   : > { %v963_v54 = vpop.f32.mrf.mxu0 }
 0x17b   : > { %v964_v63 = vadd.f32 %v2935_v56, %v963_v54 }
 0x182   : > { %v966_v60 = vpop.f32.mrf.mxu0 }
 0x183   : > { %v967_v12 = vadd.f32 %v2935_v56, %v966_v60 }
 0x18a   : > { %v968_v7 = vpop.f32.mrf.mxu0 }
 0x18b   : > { %v969_v25 = vadd.f32 %v2935_v56, %v968_v7 }
 0x192   : > { %v971_v24 = vpop.f32.mrf.mxu0 }
 0x193   : > { %v972_v39 = vadd.f32 %v2935_v56, %v971_v24 }
 0x198   : > { %v990_v58 = vpop.f32.mrf.mxu1 }
 0x199   : > { %v991_v61 = vadd.f32 %v990_v58, %v962_v59 }
 0x19a   : > { %v973_v43 = vpop.f32.mrf.mxu0 }
 0x19b   : > { %v2939_v0 = vmax.f32 %v991_v61, 0.0  ;;  %v974_v52 = vadd.f32 %v2935_v56, %v973_v43 }
 0x19d   : > { %v1229_v4 = vpack.c.bf16 %v2939_v0, %v2939_v0  ;;  %v1180_v19 = vrot.slane %v2939_v0, 1 }
 0x19f   : > { %v1277_v13 = vunpack.c.l.b16 %v1229_v4  ;;  %v1024_v4 = vadd.s32 40, %v2945_v6 }
 0x1a0   : > { %v992_v2 = vpop.f32.mrf.mxu1 }
 0x1a1   : > { %v993_v3 = vadd.f32 %v992_v2, %v964_v63 }
 0x1a2   : > { %v976_v60 = vpop.f32.mrf.mxu0 }
 0x1a3   : > { %v2943_v5 = vmax.f32 %v993_v3, 0.0  ;;  %v977_v7 = vadd.f32 %v2935_v56, %v976_v60 }
 0x1a5   : > { %v1230_v9 = vpack.c.bf16 %v2943_v5, %v2943_v5  ;;  %v1181_v15 = vrot.slane %v2943_v5, 1 }
 0x1a7   : > { %v1278_v14 = vunpack.c.l.b16 %v1230_v9  ;;  %v1195_v21 = vsel %vm1188_vm0, %v1180_v19, %v1181_v15 }
 0x1a8   : > { %v995_v8 = vpop.f32.mrf.mxu1  ;;  %v1237_v27 = vpack.c.bf16 %v1195_v21, %v1195_v21  ;;  %v1132_v21 = vrot.slane %v2943_v5, 7 }
 0x1a9   : > { %v996_v16 = vadd.f32 %v995_v8, %v967_v12  ;;  %v1285_v17 = vpack.c.b16 %v1278_v14, %v1277_v13 }
 0x1aa   : > { %v1301_v33 = vunpack.c.l.b16 %v1237_v27 }
 0x1ab   : > { %v2954_v20 = vmax.f32 %v996_v16, 0.0  ;;  %1550 = vmatmul.bf16.vlgmr.msrb.gmra.mxu3 %v1285_v17  ;;  %v978_v16 = vpop.f32.mrf.mxu0 }
 0x1ac   : > { %v979_v23 = vadd.f32 %v2935_v56, %v978_v16 }
 0x1ad   : > { %v1182_v22 = vrot.slane %v2954_v20, 1  ;;  %v1231_v35 = vpack.c.bf16 %v2954_v20, %v2954_v20 }
 0x1af   : > { %v1194_v26 = vsel %vm1188_vm0, %v1181_v15, %v1182_v22  ;;  %v1279_v40 = vunpack.c.l.b16 %v1231_v35  ;;  %v1066_v15 = vand.u32 15, %v1024_v4 }
 0x1b0   : > { %v997_v28 = vpop.f32.mrf.mxu1  ;;  %v1214_v29 = vsel %vm1173_vm1, %v1194_v26, 0.0  ;;  %v1131_v26 = vrot.slane %v2939_v0, 7 }
 0x1b1   : > { %v998_v30 = vadd.f32 %v997_v28, %v969_v25  ;;  %v1238_v31 = vpack.c.bf16 %v1214_v29, %v1214_v29  ;;  %vm1177_vm3 = vcmp.ne.s32.totalorder %v1066_v15, 15  ;;  %v1031_v29 = vand.u32 15, %v2945_v6 }
 0x1b2   : > { %v1146_v5 = vsel %vm1139_vm4, %v1131_v26, %v1132_v21 }
 0x1b3   : > { %v2964_v32 = vmax.f32 %v998_v30, 0.0  ;;  %v1302_v34 = vunpack.c.l.b16 %v1238_v31  ;;  %vm1123_vm5 = vcmp.ne.s32.totalorder %v1031_v29, 0 }
 0x1b5   : > { %v1309_v36 = vpack.c.b16 %v1302_v34, %v1301_v33  ;;  %v1232_v37 = vpack.c.bf16 %v2964_v32, %v2964_v32  ;;  %v1183_v44 = vrot.slane %v2964_v32, 1 }
 0x1b7   : > { %1579 = vmatmul.bf16.vlgmr.msra.gmra.mxu0 %v1309_v36  ;;  %v1280_v42 = vunpack.c.l.b16 %v1232_v37  ;;  %v1193_v50 = vsel %vm1188_vm0, %v1182_v22, %v1183_v44  ;;  %v1026_v22 = vadd.s32 56, %v2945_v6 }
 0x1b8   : > { %v1000_v45 = vpop.f32.mrf.mxu1  ;;  %v1239_v54 = vpack.c.bf16 %v1193_v50, %v1193_v50 }
 0x1b9   : > { %v1001_v46 = vadd.f32 %v1000_v45, %v972_v39  ;;  %v1286_v47 = vpack.c.b16 %v1280_v42, %v1279_v40  ;;  %v1080_v33 = vand.u32 15, %v1026_v22  ;;  %v1222_v42 = vpack.c.bf16 %v1146_v5, %v1146_v5 }
 0x1ba   : > { %v1303_v62 = vunpack.c.l.b16 %v1239_v54  ;;  %v1025_v22 = vadd.s32 48, %v2945_v6 }
 0x1bb   : > { %v2973_v49 = vmax.f32 %v1001_v46, 0.0  ;;  %1555 = vmatmul.bf16.gmra.mxu3 %v1286_v47  ;;  %vm1179_vm6 = vcmp.ne.s32.totalorder %v1080_v33, 15  ;;  %v1021_v47 = vadd.s32 16, %v2945_v6  ;;  %v1254_v54 = vunpack.c.l.b16 %v1222_v42 }
 0x1bd   : > { %v1184_v51 = vrot.slane %v2973_v49, 1  ;;  %v1233_v1 = vpack.c.bf16 %v2973_v49, %v2973_v49 }
 0x1bf   : > { %v1192_v53 = vsel %vm1188_vm0, %v1183_v44, %v1184_v51  ;;  %v1281_v9 = vunpack.c.l.b16 %v1233_v1 }
 0x1c0   : > { %v1002_v55 = vpop.f32.mrf.mxu1  ;;  %v1216_v57 = vsel %vm1175_vm2, %v1192_v53, 0.0 }
 0x1c1   : > { %v1003_v58 = vadd.f32 %v1002_v55, %v974_v52  ;;  %v1240_v59 = vpack.c.bf16 %v1216_v57, %v1216_v57  ;;  %v1045_v55 = vand.u32 15, %v1021_v47  ;;  %v1133_v57 = vrot.slane %v2954_v20, 7 }
 0x1c3   : > { %v2981_v61 = vmax.f32 %v1003_v58, 0.0  ;;  %v1304_v63 = vunpack.c.l.b16 %v1240_v59  ;;  %vm1125_vm7 = vcmp.ne.s32.totalorder %v1045_v55, 0  ;;  %v2332_v55 = vld [vmem:[#allocation11 + $0x20] sm:$0xff] }
 0x1c5   : > { %v1310_v2 = vpack.c.b16 %v1304_v63, %v1303_v62  ;;  %v1234_v3 = vpack.c.bf16 %v2981_v61, %v2981_v61  ;;  %v1185_v11 = vrot.slane %v2981_v61, 1  ;;  %v1145_v63 = vsel %vm1139_vm4, %v1132_v21, %v1133_v57 }
 0x1c7   : > { %1584 = vmatmul.bf16.gmra.mxu0 %v1310_v2  ;;  %v1282_v10 = vunpack.c.l.b16 %v1234_v3  ;;  %v1191_v17 = vsel %vm1188_vm0, %v1184_v51, %v1185_v11  ;;  %v1166_v2 = vsel %vm1125_vm7, %v1145_v63, 0.0 }
 0x1c8   : > { %v1005_v12 = vpop.f32.mrf.mxu1  ;;  %v1241_v25 = vpack.c.bf16 %v1191_v17, %v1191_v17  ;;  %v1223_v20 = vpack.c.bf16 %v1166_v2, %v1166_v2 }
 0x1c9   : > { %v1006_v13 = vadd.f32 %v1005_v12, %v977_v7  ;;  %v1287_v14 = vpack.c.b16 %v1282_v10, %v1281_v9  ;;  %v1023_v9 = vadd.s32 32, %v2945_v6  ;;  %v2334_v6 = vld [vmem:[#allocation11 + $0x30] sm:$0xff] }
 0x1ca   : > { %v1305_v35 = vunpack.c.l.b16 %v1241_v25  ;;  %v1255_v10 = vunpack.c.l.b16 %v1223_v20  ;;  %v1073_v25 = vand.u32 15, %v1025_v22 }
 0x1cb   : > { %v2990_v8 = vmax.f32 %v1006_v13, 0.0  ;;  %1560 = vmatmul.bf16.gmra.mxu3 %v1287_v14  ;;  %v1059_v12 = vand.u32 15, %v1023_v9  ;;  %v1136_v13 = vrot.slane %v2981_v61, 7 }
 0x1cc   : > { %vm1129_vm9 = vcmp.ne.s32.totalorder %v1073_v25, 0 }
 0x1cd   : > { %v1186_v18 = vrot.slane %v2990_v8, 1  ;;  %v1235_v36 = vpack.c.bf16 %v2990_v8, %v2990_v8  ;;  %vm1127_vm8 = vcmp.ne.s32.totalorder %v1059_v12, 0 }
 0x1cf   : > { %v1190_v24 = vsel %vm1188_vm0, %v1185_v11, %v1186_v18  ;;  %v1283_v43 = vunpack.c.l.b16 %v1235_v36  ;;  %v2335_v36 = vld [vmem:[#allocation11 + $0x38] sm:$0xff] }
 0x1d0   : > { %v1007_v27 = vpop.f32.mrf.mxu1  ;;  %v1218_v28 = vsel %vm1177_vm3, %v1190_v24, 0.0  ;;  %1724 = vmatpush.bf16.msra.mxu1 %v2335_v36 }
 0x1d1   : > { %v1008_v30 = vadd.f32 %v1007_v27, %v979_v23  ;;  %v1242_v31 = vpack.c.bf16 %v1218_v28, %v1218_v28 }
 0x1d3   : > { %v3005_v34 = vmax.f32 %v1008_v30, 0.0  ;;  %v1306_v56 = vunpack.c.l.b16 %v1242_v31 }
 0x1d4   : > { %1725 = vmatpush.bf16.msra.mxu1 %v2334_v6 }
 0x1d5   : > { %v1138_v37 = vrot.slane %v3005_v34, 7  ;;  %v1187_v38 = vrot.slane %v3005_v34, 1  ;;  %v1311_v39 = vpack.c.b16 %v1306_v56, %v1305_v35  ;;  %v1236_v40 = vpack.c.bf16 %v3005_v34, %v3005_v34 }
 0x1d7   : > { %v1147_v41 = vsel %vm1139_vm4, %v1138_v37, %v1131_v26  ;;  %1589 = vmatmul.bf16.gmra.mxu0 %v1311_v39  ;;  %v1284_v44 = vunpack.c.l.b16 %v1236_v40  ;;  %v1196_v45 = vsel %vm1188_vm0, %v1187_v38, %v1180_v19  ;;  %v1189_v51 = vsel %vm1188_vm0, %v1186_v18, %v1187_v38 }
 0x1d8   : > { %v1164_v46 = vsel %vm1123_vm5, %v1147_v41, 0.0  ;;  %v1220_v52 = vsel %vm1179_vm6, %v1196_v45, 0.0  ;;  %v1243_v0 = vpack.c.bf16 %v1189_v51, %v1189_v51  ;;  %v1134_v19 = vrot.slane %v2964_v32, 7  ;;  %v2333_v41 = vld [vmem:[#allocation11 + $0x28] sm:$0xff]  ;;  %v2446_v45 = vld [vmem:[%s3087_s6] ss:$0 sm:$0xff] }
 0x1d9   : > { %v1288_v48 = vpack.c.b16 %v1284_v44, %v1283_v43  ;;  %v1221_v50 = vpack.c.bf16 %v1164_v46, %v1164_v46  ;;  %v1244_v59 = vpack.c.bf16 %v1220_v52, %v1220_v52  ;;  %v1135_v32 = vrot.slane %v2973_v49, 7  ;;  %1726 = vmatpush.bf16.msra.mxu1 %v2333_v41 }
 0x1da   : > { %v1307_v60 = vunpack.c.l.b16 %v1243_v0  ;;  %v1144_v1 = vsel %vm1139_vm4, %v1133_v57, %v1134_v19  ;;  %v1137_v49 = vrot.slane %v2990_v8, 7 }
 0x1db   : > { %1565 = vmatmul.bf16.gmra.mxu3 %v1288_v48  ;;  %v1253_v53 = vunpack.c.l.b16 %v1221_v50  ;;  %v1308_v62 = vunpack.c.l.b16 %v1244_v59  ;;  %v1224_v4 = vpack.c.bf16 %v1144_v1, %v1144_v1  ;;  %v1143_v14 = vsel %vm1139_vm4, %v1134_v19, %v1135_v32  ;;  %v2331_v59 = vld [vmem:[#allocation11 + $0x18] sm:$0xff] }
 0x1dc   : > { %v1142_v15 = vsel %vm1139_vm4, %v1135_v32, %v1136_v13  ;;  %v1168_v16 = vsel %vm1127_vm8, %v1143_v14, 0.0  ;;  %v1141_v61 = vsel %vm1139_vm4, %v1136_v13, %v1137_v49  ;;  %v1140_v26 = vsel %vm1139_vm4, %v1137_v49, %v1138_v37 }
 0x1dd   : > { %v1261_v58 = vpack.c.b16 %v1254_v54, %v1253_v53  ;;  %v1312_v3 = vpack.c.b16 %v1308_v62, %v1307_v60  ;;  %v1256_v7 = vunpack.c.l.b16 %v1224_v4  ;;  %v1226_v17 = vpack.c.bf16 %v1142_v15, %v1142_v15  ;;  %1727 = vmatpush.bf16.msra.mxu1 %v2332_v55 }
 0x1de   : > { %v1225_v18 = vpack.c.bf16 %v1168_v16, %v1168_v16  ;;  %v1170_v27 = vsel %vm1129_vm9, %v1141_v61, 0.0  ;;  %v1228_v28 = vpack.c.bf16 %v1140_v26, %v1140_v26 }
 0x1df   : > { %1521 = vmatmul.bf16.vlgmr.msra.gmra.mxu2 %v1261_v58  ;;  %v1262_v11 = vpack.c.b16 %v1256_v7, %v1255_v10  ;;  %v1258_v21 = vunpack.c.l.b16 %v1226_v17  ;;  %v1227_v29 = vpack.c.bf16 %v1170_v27, %v1170_v27  ;;  %v2330_v10 = vld [vmem:[#allocation11 + $0x10] sm:$0xff]  ;;  %v2329_v17 = vld [vmem:[#allocation11 + $0x8] sm:$0xff] }
 0x1e0   : > { %v1257_v23 = vunpack.c.l.b16 %v1225_v18  ;;  %v1260_v30 = vunpack.c.l.b16 %v1228_v28 }
 0x1e1   : > { %v1259_v31 = vunpack.c.l.b16 %v1227_v29  ;;  %1728 = vmatpush.bf16.msra.mxu1 %v2331_v59 }
 0x1e2   : > { %v1263_v24 = vpack.c.b16 %v1258_v21, %v1257_v23 }
 0x1e3   : > { %v1264_v5 = vpack.c.b16 %v1260_v30, %v1259_v31 }
 0x1e5   : > { %1729 = vmatpush.bf16.msra.mxu1 %v2330_v10 }
 0x1e7   : > { %1594 = vmatmul.bf16.gmra.mxu0 %v1312_v3 }
 0x1e9   : > { %1730 = vmatpush.bf16.msra.mxu1 %v2329_v17 }
 0x1ef   : > { %1526 = vmatmul.bf16.gmra.mxu2 %v1262_v11 }
 0x1ff   : > { %1531 = vmatmul.bf16.gmra.mxu2 %v1263_v24  ;;  %v2328_v24 = vld [vmem:[#allocation11] sm:$0xff] }
 0x200   : > { %1731 = vmatpush.bf16.msra.mxu1 %v2328_v24 }
 0x20f   : > { %1536 = vmatmul.bf16.gmra.mxu2 %v1264_v5 }
 0x22e   : > { %v1551_v33 = vpop.f32.mrf.mxu3 }
 0x234   : > { %v1580_v34 = vpop.f32.mrf.mxu0 }
 0x236   : > { %v1553_v8 = vpop.f32.mrf.mxu3 }
 0x23c   : > { %v1582_v35 = vpop.f32.mrf.mxu0 }
 0x23e   : > { %v1556_v38 = vpop.f32.mrf.mxu3 }
 0x244   : > { %v1585_v40 = vpop.f32.mrf.mxu0 }
 0x246   : > { %v1558_v37 = vpop.f32.mrf.mxu3 }
 0x24c   : > { %v1587_v43 = vpop.f32.mrf.mxu0 }
 0x24e   : > { %v1561_v46 = vpop.f32.mrf.mxu3 }
 0x254   : > { %v1590_v48 = vpop.f32.mrf.mxu0 }
 0x256   : > { %v1563_v62 = vpop.f32.mrf.mxu3 }
 0x25c   : > { %v1592_v3 = vpop.f32.mrf.mxu0 }
 0x25e   : > { %v1566_v23 = vpop.f32.mrf.mxu3 }
 0x262   : > { %v1522_v56 = vpop.f32.mrf.mxu2 }
 0x263   : > { %v1523_v53 = vadd.f32 %v2446_v45, %v1522_v56 }
 0x264   : > { %v1595_v26 = vpop.f32.mrf.mxu0 }
 0x265   : > { %v1552_v19 = vadd.f32 %v1551_v33, %v1523_v53 }
 0x266   : > { %v1568_v56 = vpop.f32.mrf.mxu3 }
 0x267   : > { %v1581_v20 = vadd.f32 %v1580_v34, %v1552_v19 }
 0x269   : > { %v1600_v14 = vmax.f32 %v1581_v20, 0.0 }
 0x26a   : > { %v1524_v39 = vpop.f32.mrf.mxu2 }
 0x26b   : > { %v1525_v50 = vadd.f32 %v2446_v45, %v1524_v39 }
 0x26d   : > { %v1554_v57 = vadd.f32 %v1553_v8, %v1525_v50 }
 0x26f   : > { %v1583_v63 = vadd.f32 %v1582_v35, %v1554_v57 }
 0x271   : > { %v1601_v32 = vmax.f32 %v1583_v63, 0.0 }
 0x272   : > { %v1527_v42 = vpop.f32.mrf.mxu2 }
 0x273   : > { %v1528_v51 = vadd.f32 %v2446_v45, %v1527_v42  ;;  %v1608_v18 = vmax.f32 %v1600_v14, %v1601_v32  ;;  %v1597_v42 = vpop.f32.mrf.mxu0  ;;  %v2447_v32 = vld [vmem:[%s3089_s8] ss:$0 sm:$0xff] }
 0x275   : > { %v1557_v58 = vadd.f32 %v1556_v38, %v1528_v51  ;;  %v1609_v27 = vrot.slane %v1608_v18, 4 }
 0x277   : > { %v1586_v1 = vadd.f32 %v1585_v40, %v1557_v58  ;;  %v1610_v5 = vmax.f32 %v1608_v18, %v1609_v27 }
 0x279   : > { %v1602_v11 = vmax.f32 %v1586_v1, 0.0  ;;  %v1611_v38 = vrot.slane %v1610_v5, 2 }
 0x27a   : > { %v1529_v44 = vpop.f32.mrf.mxu2 }
 0x27b   : > { %v1530_v47 = vadd.f32 %v2446_v45, %v1529_v44 }
 0x27d   : > { %v1559_v54 = vadd.f32 %v1558_v37, %v1530_v47 }
 0x27f   : > { %v1588_v60 = vadd.f32 %v1587_v43, %v1559_v54  ;;  %v1612_v43 = vmax.f32 %v1610_v5, %v1611_v38 }
 0x281   : > { %v1603_v7 = vmax.f32 %v1588_v60, 0.0  ;;  %v1613_v51 = vrot.slane %v1612_v43, 1 }
 0x282   : > { %v1532_v52 = vpop.f32.mrf.mxu2 }
 0x283   : > { %v1533_v0 = vadd.f32 %v2446_v45, %v1532_v52  ;;  %v1615_v15 = vmax.f32 %v1602_v11, %v1603_v7  ;;  %v1614_v55 = vmax.f32 %v1612_v43, %v1613_v51 }
 0x285   : > { %v1562_v2 = vadd.f32 %v1561_v46, %v1533_v0  ;;  %v1616_v25 = vrot.slane %v1615_v15, 4  ;;  %v1636_v19 = vpack.c.bf16 %v1614_v55, %v1614_v55 }
 0x287   : > { %v1591_v12 = vadd.f32 %v1590_v48, %v1562_v2  ;;  %v1617_v30 = vmax.f32 %v1615_v15, %v1616_v25  ;;  %v1664_v2 = vunpack.c.l.b16 %v1636_v19 }
 0x289   : > { %v1604_v21 = vmax.f32 %v1591_v12, 0.0  ;;  %v1618_v8 = vrot.slane %v1617_v30, 2 }
 0x28a   : > { %v1534_v4 = vpop.f32.mrf.mxu2 }
 0x28b   : > { %v1535_v9 = vadd.f32 %v2446_v45, %v1534_v4  ;;  %v1619_v6 = vmax.f32 %v1617_v30, %v1618_v8 }
 0x28d   : > { %v1564_v13 = vadd.f32 %v1563_v62, %v1535_v9  ;;  %v1620_v47 = vrot.slane %v1619_v6, 1 }
 0x28f   : > { %v1593_v16 = vadd.f32 %v1592_v3, %v1564_v13  ;;  %v1621_v53 = vmax.f32 %v1619_v6, %v1620_v47 }
 0x291   : > { %v1605_v22 = vmax.f32 %v1593_v16, 0.0  ;;  %v1637_v58 = vpack.c.bf16 %v1621_v53, %v1621_v53 }
 0x292   : > { %v1537_v49 = vpop.f32.mrf.mxu2 }
 0x293   : > { %v1622_v61 = vmax.f32 %v1604_v21, %v1605_v22  ;;  %v1538_v29 = vadd.f32 %v2446_v45, %v1537_v49  ;;  %v1665_v62 = vunpack.c.l.b16 %v1637_v58 }
 0x295   : > { %v1623_v28 = vrot.slane %v1622_v61, 4  ;;  %v1567_v33 = vadd.f32 %v1566_v23, %v1538_v29  ;;  %v1669_v20 = vsel %vm1668_vm10, %v1665_v62, %v1664_v2 }
 0x297   : > { %v1624_v31 = vmax.f32 %v1622_v61, %v1623_v28  ;;  %v1596_v39 = vadd.f32 %v1595_v26, %v1567_v33 }
 0x299   : > { %v1625_v36 = vrot.slane %v1624_v31, 2  ;;  %v1606_v44 = vmax.f32 %v1596_v39, 0.0 }
 0x29a   : > { %v1539_v34 = vpop.f32.mrf.mxu2 }
 0x29b   : > { %v1540_v35 = vadd.f32 %v2446_v45, %v1539_v34  ;;  %v1626_v41 = vmax.f32 %v1624_v31, %v1625_v36 }
 0x29d   : > { %v1569_v40 = vadd.f32 %v1568_v56, %v1540_v35  ;;  %v1627_v50 = vrot.slane %v1626_v41, 1 }
 0x29f   : > { %v1598_v37 = vadd.f32 %v1597_v42, %v1569_v40  ;;  %v1628_v45 = vmax.f32 %v1626_v41, %v1627_v50 }
 0x2a1   : > { %v1607_v46 = vmax.f32 %v1598_v37, 0.0  ;;  %v1638_v59 = vpack.c.bf16 %v1628_v45, %v1628_v45 }
 0x2a3   : > { %v1629_v48 = vmax.f32 %v1606_v44, %v1607_v46  ;;  %v1666_v1 = vunpack.c.l.b16 %v1638_v59 }
 0x2a5   : > { %v1630_v52 = vrot.slane %v1629_v48, 4  ;;  %v1671_v7 = vsel %vm1670_vm11, %v1666_v1, %v1669_v20 }
 0x2a7   : > { %v1631_v54 = vmax.f32 %v1629_v48, %v1630_v52 }
 0x2a9   : > { %v1632_v57 = vrot.slane %v1631_v54, 2 }
 0x2ab   : > { %v1633_v0 = vmax.f32 %v1631_v54, %v1632_v57 }
 0x2ad   : > { %v1634_v60 = vrot.slane %v1633_v0, 1 }
 0x2af   : > { %v1635_v63 = vmax.f32 %v1633_v0, %v1634_v60 }
 0x2b1   : > { %v1639_v3 = vpack.c.bf16 %v1635_v63, %v1635_v63 }
 0x2b3   : > { %v1667_v4 = vunpack.c.l.b16 %v1639_v3 }
 0x2b5   : > { %v1673_v9 = vsel %vm1672_vm12, %v1667_v4, %v1671_v7 }
 0x2b6   : > { %v1674_v10 = vpack.c.b16 %v1673_v9, %v1673_v9 }
 0x2b8   : > { %1732 = vmatmul.bf16.vlgmr.msra.gmra.mxu1 %v1674_v10 }
 0x335   : > { %v1733_v11 = vpop.f32.mrf.mxu1 }
 0x336   : > { %v1734_v12 = vadd.f32 %v2447_v32, %v1733_v11 }
 0x338   : > { %1737 = vst [vmem:[%s433_s2] sm:$0xf] %v1734_v12 }
 0x339   : > { %2655 = shalt.err (!%p2652_p9)
}
 0x33a   : > { %2366 = dma.vmem_to_hbm [thread:$0]  (%p2856_p13), %s1752_s3, 64, %s1754_s14, %s1739_s17  }
 0x33d   : > { %v1735_v13 = vpop.f32.mrf.mxu1 }
 0x33e PF: > { %s1765_s13 = sand.u32 1, %s2694_s30   ;;  %p3107_p10 = scmp.ge.s32.totalorder %s2706_s12, 2 }
 0x33f   : > { %s1766_s1 = scalar_lea.sflag [#allocation4], %s1765_s13 }
 0x340   : > { %p2389_p11 = pnand %p3107_p10, %p2861_p4 }
 0x342   : > { %p2390_p0 = pneg %p2389_p11 }
 0x344   : > { %2689 = dma.done.wait (%p2390_p0), %s1766_s1, 64  }
 0x345   : > { %2691 = vsyncadd (%p2390_p0), %s1766_s1, 4294967232  ;;  %p25_p2 = scmp.ge.s32.totalorder %s2836_s21, 4   ;;  %s3108_s30 = smov %s2698_s10 }
 0x346   : > { %s3109_s10 = smov %s2702_s11  ;;  %s3110_s11 = smov %s2848_s15 }
 0x347   : > { %s3111_s12 = smov %s2836_s21  ;;  %27 = sbr.rel (!%p25_p2) target bundleno = 12 (0xc), region = 121 }
 0x34c   :  { %1772 = vsyncpa [#allocation3], 1 }
 0x34d   :  { %1774 = vsyncpa [#allocation3 + $0x1], 1 }
 0x34e   :  { %1775 = vsyncpa [#allocation6], 1 }
 0x34f   :  { %1776 = vsyncpa [#allocation9], 1 }
 0x350   :  { %1777 = vsyncpa [#allocation12], 1 }
 0x351   :  { %1778 = vsyncpa [#allocation4], 1 }
 0x352   :  { %1780 = vsyncpa [#allocation4 + $0x1], 1 }

</bundles_post_ra>
